<compile_context>
chip_gen: v7x
topology: tpu7x:2x2x1
jax: 0.10.0
libtpu: 0.0.40
codegen_flags: <defaults>
</compile_context>

<pallas_src>
import numpy as np
import jax
import jax.numpy as jnp
from jax.experimental import pallas as pl
from jax.experimental.pallas import tpu as pltpu

FEATURE_DIM = 63
FEAT_PAD = 64     # 63 -> 64 (zero feature column / zero weight row)
OUT_PAD = 128     # 2  -> 128 (lane-dense output, sliced afterwards)
NODES = 16        # padded nodes per graph
SUB = 8           # graphs per 128-node sub-pack
M = SUB * NODES   # 128 packed nodes per sub-pack


def _gcn_kernel(bd_ref, adjT_ref, adj0_ref, vec_ref, s0_ref,
                w1_ref, b1_ref, w2_ref, b2_ref, wf_ref, bf_ref, out_ref):
    n_sub = bd_ref.shape[0]          # sub-packs per grid step (static)
    w1 = w1_ref[...]                 # [64, D]   (hoisted out of the loop)
    b1 = b1_ref[...]                 # [1, D]
    s0 = s0_ref[...]                 # [SUB, M] constant node-0 selector

    x0_parts, agg2_parts = [], []
    for s in range(n_sub):           # static unrolled inner loop
        bd = bd_ref[s]               # [M, M]  block-diagonal adjacency (0/1)
        adjT = adjT_ref[s]           # [M, N]  row (b,j) = adj[b, :, j]
        adj0 = adj0_ref[s]           # [SUB, M] node-0 rows, block-placed
        vec = vec_ref[s]             # [M, 64]

        # degrees via cheap lane reductions; clamp >= 1; rsqrt on the EUP
        dst_n = jax.lax.rsqrt(jnp.maximum(jnp.sum(bd, axis=1, keepdims=True), 1.0))
        src_n = jax.lax.rsqrt(jnp.maximum(jnp.sum(adjT, axis=1, keepdims=True), 1.0))

        # layer 1 (embed), all rows:  x = ReLU(dst_n * (A @ (src_n * vec)) @ W1 + b1)
        agg1 = dst_n * jnp.dot(bd, src_n * vec, preferred_element_type=jnp.float32)
        x = jnp.maximum(
            jnp.dot(agg1, w1, preferred_element_type=jnp.float32) + b1, 0.0)  # [M, D]

        # node-0 rows of x via constant selection matmul (MXU, no sublane gather)
        x0_parts.append(jnp.dot(s0, x, preferred_element_type=jnp.float32))   # [SUB, D]

        # layer 2 (conv): only the node-0 rows are ever used
        dst_n0 = jax.lax.rsqrt(jnp.maximum(jnp.sum(adj0, axis=1, keepdims=True), 1.0))
        agg2_parts.append(
            dst_n0 * jnp.dot(adj0, src_n * x, preferred_element_type=jnp.float32))

    x0 = x0_parts[0] if n_sub == 1 else jnp.concatenate(x0_parts, axis=0)      # [Bt, D]
    agg2 = agg2_parts[0] if n_sub == 1 else jnp.concatenate(agg2_parts, axis=0)

    y0 = jnp.maximum(
        jnp.dot(agg2, w2_ref[...], preferred_element_type=jnp.float32) + b2_ref[...],
        0.0)                                                                    # [Bt, D]

    # head: result = Linear(x[0] + y[0])  -> lane-dense [Bt, OUT_PAD] store
    out_ref[...] = (jnp.dot(x0 + y0, wf_ref[...], preferred_element_type=jnp.float32)
                    + bf_ref[...])


def models_forward(adj, vec, params, graphs_per_step=16):
    """adj: [B,N,N] f32, vec: [B,N,FEAT_PAD] f32 -> [B,2] f32."""
    w1, b1, w2, b2, wf, bf = params
    B, N, _ = adj.shape
    assert N == NODES
    D = w1.shape[1]

    Bt = graphs_per_step
    assert Bt % SUB == 0
    n_sub = Bt // SUB
    Bp = ((B + Bt - 1) // Bt) * Bt
    if Bp != B:  # pad the batch with empty graphs; results are sliced off
        adj = jnp.concatenate([adj, jnp.zeros((Bp - B, N, N), adj.dtype)], axis=0)
        vec = jnp.concatenate([vec, jnp.zeros((Bp - B, N, FEAT_PAD), vec.dtype)], axis=0)
    G = Bp // Bt          # grid steps
    n_packs = Bp // SUB   # total 128-node sub-packs

    # ---- wrapper-side layout packing (pure plumbing; hot math stays in kernel)
    adj4 = adj.reshape(n_packs, SUB, N, N)
    r = np.arange(M)
    blk_mask = jnp.asarray((r[:, None] // N) == (r[None, :] // N))       # [M, M]
    bd = jnp.where(blk_mask,
                   jnp.tile(adj4.reshape(n_packs, M, N), (1, 1, SUB)), 0.0)       # [p, M, M]
    adjT = jnp.transpose(adj4, (0, 1, 3, 2)).reshape(n_packs, M, N)               # [p, M, N]
    sel0 = jnp.asarray((r[None, :] // N) == np.arange(SUB)[:, None])     # [SUB, M]
    adj0 = jnp.where(sel0, jnp.tile(adj4[:, :, 0, :], (1, 1, SUB)), 0.0)          # [p, SUB, M]
    vecp = vec.reshape(n_packs, M, FEAT_PAD)                                      # [p, M, 64]

    s0_np = np.zeros((SUB, M), np.float32)
    s0_np[np.arange(SUB), np.arange(SUB) * N] = 1.0                      # node-0 selector
    s0 = jnp.asarray(s0_np)

    out = pl.pallas_call(
        _gcn_kernel,
        out_shape=jax.ShapeDtypeStruct((Bp, OUT_PAD), jnp.float32),
        grid_spec=pltpu.PrefetchScalarGridSpec(
            num_scalar_prefetch=0,
            grid=(G,),
            in_specs=[
                pl.BlockSpec((n_sub, M, M), lambda g: (g, 0, 0)),          # bd
                pl.BlockSpec((n_sub, M, N), lambda g: (g, 0, 0)),          # adjT
                pl.BlockSpec((n_sub, SUB, M), lambda g: (g, 0, 0)),        # adj0
                pl.BlockSpec((n_sub, M, FEAT_PAD), lambda g: (g, 0, 0)),   # vec
                pl.BlockSpec((SUB, M), lambda g: (0, 0)),                  # S0 (const)
                pl.BlockSpec((FEAT_PAD, D), lambda g: (0, 0)),             # W1
                pl.BlockSpec((1, D), lambda g: (0, 0)),                    # b1
                pl.BlockSpec((D, D), lambda g: (0, 0)),                    # W2
                pl.BlockSpec((1, D), lambda g: (0, 0)),                    # b2
                pl.BlockSpec((D, OUT_PAD), lambda g: (0, 0)),              # Wf (padded)
                pl.BlockSpec((1, OUT_PAD), lambda g: (0, 0)),              # bf (padded)
            ],
            out_specs=pl.BlockSpec((Bt, OUT_PAD), lambda g: (g, 0)),
        ),
        compiler_params=pltpu.CompilerParams(
            dimension_semantics=("parallel",)),
    )(bd, adjT, adj0, vecp, s0, w1, b1, w2, b2, wf, bf)
    return out[:B, :2]


def init_params(key, dim=64):
    """Deterministic synthetic init mirroring the module's parameter shapes."""
    k1, k2, k3, k4 = jax.random.split(key, 4)

    def xavier(k, shape):
        a = float(np.sqrt(6.0 / (shape[0] + shape[1])))
        return jax.random.uniform(k, shape, jnp.float32, -a, a)

    w1 = xavier(k1, (FEATURE_DIM, dim))                       # DenseGraphConv weight
    w1 = jnp.concatenate(
        [w1, jnp.zeros((FEAT_PAD - FEATURE_DIM, dim), jnp.float32)], axis=0)
    b1 = jnp.zeros((1, dim), jnp.float32)
    w2 = xavier(k2, (dim, dim))
    b2 = jnp.zeros((1, dim), jnp.float32)

    bound = 1.0 / np.sqrt(dim)                                # nn.Linear(dim, 2)
    wf = jax.random.uniform(k3, (dim, 2), jnp.float32, -bound, bound)
    bf = jax.random.uniform(k4, (1, 2), jnp.float32, -bound, bound)
    wf_p = jnp.concatenate([wf, jnp.zeros((dim, OUT_PAD - 2), jnp.float32)], axis=1)
    bf_p = jnp.concatenate([bf, jnp.zeros((1, OUT_PAD - 2), jnp.float32)], axis=1)
    return (w1, b1, w2, b2, wf_p, bf_p), (wf, bf)


def reference_forward(adj, vec, params, wf, bf):
    """Pure-JAX reference of the same math (per-graph loop, like torch forward)."""
    w1, b1, w2, b2, _, _ = params
    hp = jax.lax.Precision.HIGHEST

    def layer(a, feat, w, b):
        col = jnp.maximum(a.sum(0, keepdims=True), 1.0)
        row = jnp.maximum(a.sum(1, keepdims=True), 1.0)
        an = a * jax.lax.rsqrt(row) * jax.lax.rsqrt(col)
        agg = jnp.dot(an, feat, precision=hp)
        return jnp.maximum(jnp.dot(agg, w, precision=hp) + b, 0.0)

    outs = []
    for i in range(adj.shape[0]):
        x = layer(adj[i], vec[i], w1, b1)
        y = layer(adj[i], x, w2, b2)
        h = x[0:1, :] + y[0:1, :]
        outs.append(jnp.dot(h, wf, precision=hp) + bf)
    return jnp.concatenate(outs, axis=0)


if __name__ == "__main__":
    # TODO(synk): SMILES/RDKit/DGL graph construction (Models.process) is host
    # preprocessing; it is emulated here with synthetic padded molecular graphs.
    B, N, DIM, BT = 32, NODES, 64, 16   # BT=16 -> 2 sub-packs/step, grid = 2
    key = jax.random.PRNGKey(0)
    ka, kb, kv, kp = jax.random.split(key, 4)

    # Synthetic molecular graphs padded to N nodes (variable real sizes),
    # mimicking Models.process(): node 0 is a virtual node with zero features,
    # self loops on every real node, edges from all real nodes into node 0,
    # plus random symmetric "bond" edges.
    n_real = np.asarray(jax.random.randint(kb, (B,), 4, N + 1))
    bits = np.asarray(jax.random.bernoulli(ka, 0.25, (B, N, N)), dtype=np.float32)
    adj_np = np.zeros((B, N, N), np.float32)
    for i in range(B):
        n = int(n_real[i])
        bond = np.maximum(bits[i, :n, :n], bits[i, :n, :n].T)
        adj_np[i, :n, :n] = bond
        adj_np[i, np.arange(n), np.arange(n)] = 1.0   # self loops
        adj_np[i, 0, 1:n] = 1.0                       # node 0 aggregates all atoms

    feats = np.asarray(jax.random.uniform(kv, (B, N, FEATURE_DIM)), dtype=np.float32)
    vec_np = np.zeros((B, N, FEAT_PAD), np.float32)
    for i in range(B):
        n = int(n_real[i])
        vec_np[i, 1:n, :FEATURE_DIM] = feats[i, 1:n]  # node 0 row = 0

    adj = jnp.asarray(adj_np)
    vec = jnp.asarray(vec_np)
    params, (wf, bf) = init_params(kp, DIM)

    result = models_forward(adj, vec, params, graphs_per_step=BT)
    jax.block_until_ready(result)
    assert result.shape == (B, 2), result.shape

    ref = reference_forward(adj, vec, params, wf, bf)
    np.testing.assert_allclose(np.asarray(result), np.asarray(ref),
                               rtol=2e-3, atol=2e-3)
    print("KERNEL_OK")
</pallas_src>

<mosaic_0001>
module attributes {stable_mosaic.version = 11 : i64} {
  func.func @_gcn_kernel(%arg0: i32, %arg1: memref<2x128x128xf32, #tpu.memory_space<vmem>>, %arg2: memref<2x128x16xf32, #tpu.memory_space<vmem>>, %arg3: memref<2x8x128xf32, #tpu.memory_space<vmem>>, %arg4: memref<2x128x64xf32, #tpu.memory_space<vmem>>, %arg5: memref<8x128xf32, #tpu.memory_space<vmem>>, %arg6: memref<64x64xf32, #tpu.memory_space<vmem>>, %arg7: memref<1x64xf32, #tpu.memory_space<vmem>>, %arg8: memref<64x64xf32, #tpu.memory_space<vmem>>, %arg9: memref<1x64xf32, #tpu.memory_space<vmem>>, %arg10: memref<64x128xf32, #tpu.memory_space<vmem>>, %arg11: memref<1x128xf32, #tpu.memory_space<vmem>>, %arg12: memref<16x128xf32, #tpu.memory_space<vmem>>) attributes {dimension_semantics = [#tpu.dimension_semantics<parallel>], iteration_bounds = array<i64: 2>, scalar_prefetch = 0 : i64, scratch_operands = 0 : i64, tpu.core_type = #tpu.core_type<tc>, window_params = [{transform_indices = @transform_0, window_bounds = array<i64: 2, 128, 128>}, {transform_indices = @transform_1, window_bounds = array<i64: 2, 128, 16>}, {transform_indices = @transform_2, window_bounds = array<i64: 2, 8, 128>}, {transform_indices = @transform_3, window_bounds = array<i64: 2, 128, 64>}, {pipeline_mode = #tpu.pipeline_mode<synchronous>, transform_indices = @transform_4, window_bounds = array<i64: 8, 128>}, {pipeline_mode = #tpu.pipeline_mode<synchronous>, transform_indices = @transform_5, window_bounds = array<i64: 64, 64>}, {pipeline_mode = #tpu.pipeline_mode<synchronous>, transform_indices = @transform_6, window_bounds = array<i64: 1, 64>}, {pipeline_mode = #tpu.pipeline_mode<synchronous>, transform_indices = @transform_7, window_bounds = array<i64: 64, 64>}, {pipeline_mode = #tpu.pipeline_mode<synchronous>, transform_indices = @transform_8, window_bounds = array<i64: 1, 64>}, {pipeline_mode = #tpu.pipeline_mode<synchronous>, transform_indices = @transform_9, window_bounds = array<i64: 64, 128>}, {pipeline_mode = #tpu.pipeline_mode<synchronous>, transform_indices = @transform_10, window_bounds = array<i64: 1, 128>}, {transform_indices = @transform_11, window_bounds = array<i64: 16, 128>}]} {
    %c0 = arith.constant 0 : index
    %c0_0 = arith.constant 0 : index
    %0 = vector.load %arg6[%c0, %c0_0] : memref<64x64xf32, #tpu.memory_space<vmem>>, vector<64x64xf32>
    %c0_1 = arith.constant 0 : index
    %c0_2 = arith.constant 0 : index
    %1 = vector.load %arg7[%c0_1, %c0_2] : memref<1x64xf32, #tpu.memory_space<vmem>>, vector<1x64xf32>
    %c0_3 = arith.constant 0 : index
    %c0_4 = arith.constant 0 : index
    %2 = vector.load %arg5[%c0_3, %c0_4] : memref<8x128xf32, #tpu.memory_space<vmem>>, vector<8x128xf32>
    %c0_5 = arith.constant 0 : index
    %c0_6 = arith.constant 0 : index
    %c0_7 = arith.constant 0 : index
    %3 = vector.load %arg1[%c0_5, %c0_6, %c0_7] : memref<2x128x128xf32, #tpu.memory_space<vmem>>, vector<1x128x128xf32>
    %4 = vector.shape_cast %3 : vector<1x128x128xf32> to vector<128x128xf32>
    %c0_8 = arith.constant 0 : index
    %c0_9 = arith.constant 0 : index
    %c0_10 = arith.constant 0 : index
    %5 = vector.load %arg2[%c0_8, %c0_9, %c0_10] : memref<2x128x16xf32, #tpu.memory_space<vmem>>, vector<1x128x16xf32>
    %6 = vector.shape_cast %5 : vector<1x128x16xf32> to vector<128x16xf32>
    %c0_11 = arith.constant 0 : index
    %c0_12 = arith.constant 0 : index
    %c0_13 = arith.constant 0 : index
    %7 = vector.load %arg3[%c0_11, %c0_12, %c0_13] : memref<2x8x128xf32, #tpu.memory_space<vmem>>, vector<1x8x128xf32>
    %8 = vector.shape_cast %7 : vector<1x8x128xf32> to vector<8x128xf32>
    %c0_14 = arith.constant 0 : index
    %c0_15 = arith.constant 0 : index
    %c0_16 = arith.constant 0 : index
    %9 = vector.load %arg4[%c0_14, %c0_15, %c0_16] : memref<2x128x64xf32, #tpu.memory_space<vmem>>, vector<1x128x64xf32>
    %10 = vector.shape_cast %9 : vector<1x128x64xf32> to vector<128x64xf32>
    %cst = arith.constant dense<0.000000e+00> : vector<128xf32>
    %11 = vector.multi_reduction <add>, %4, %cst [1] : vector<128x128xf32> to vector<128xf32>
    %12 = vector.shape_cast %11 : vector<128xf32> to vector<128x1xf32>
    %cst_17 = arith.constant 1.000000e+00 : f32
    %13 = vector.broadcast %cst_17 : f32 to vector<128x1xf32>
    %14 = arith.maximumf %12, %13 : vector<128x1xf32>
    %15 = math.rsqrt %14 : vector<128x1xf32>
    %cst_18 = arith.constant dense<0.000000e+00> : vector<128xf32>
    %16 = vector.multi_reduction <add>, %6, %cst_18 [1] : vector<128x16xf32> to vector<128xf32>
    %17 = vector.shape_cast %16 : vector<128xf32> to vector<128x1xf32>
    %cst_19 = arith.constant 1.000000e+00 : f32
    %18 = vector.broadcast %cst_19 : f32 to vector<128x1xf32>
    %19 = arith.maximumf %17, %18 : vector<128x1xf32>
    %20 = math.rsqrt %19 : vector<128x1xf32>
    %21 = vector.broadcast %20 : vector<128x1xf32> to vector<128x64xf32>
    %22 = arith.mulf %21, %10 : vector<128x64xf32>
    %cst_20 = arith.constant dense<0.000000e+00> : vector<128x64xf32>
    %23 = tpu.matmul %4, %22, %cst_20 {dimension_numbers = #tpu.dot_dimension_numbers<[1], [0], [0], [1], [0, 0, 1, 1], [], []>} : vector<128x128xf32>, vector<128x64xf32>, vector<128x64xf32> -> vector<128x64xf32>
    %24 = vector.broadcast %15 : vector<128x1xf32> to vector<128x64xf32>
    %25 = arith.mulf %24, %23 : vector<128x64xf32>
    %cst_21 = arith.constant dense<0.000000e+00> : vector<128x64xf32>
    %26 = tpu.matmul %25, %0, %cst_21 {dimension_numbers = #tpu.dot_dimension_numbers<[1], [0], [0], [1], [0, 0, 1, 1], [], []>} : vector<128x64xf32>, vector<64x64xf32>, vector<128x64xf32> -> vector<128x64xf32>
    %27 = vector.broadcast %1 : vector<1x64xf32> to vector<128x64xf32>
    %28 = arith.addf %26, %27 : vector<128x64xf32>
    %cst_22 = arith.constant 0.000000e+00 : f32
    %29 = vector.broadcast %cst_22 : f32 to vector<128x64xf32>
    %30 = arith.maximumf %28, %29 : vector<128x64xf32>
    %cst_23 = arith.constant dense<0.000000e+00> : vector<8x64xf32>
    %31 = tpu.matmul %2, %30, %cst_23 {dimension_numbers = #tpu.dot_dimension_numbers<[1], [0], [0], [1], [0, 0, 1, 1], [], []>} : vector<8x128xf32>, vector<128x64xf32>, vector<8x64xf32> -> vector<8x64xf32>
    %cst_24 = arith.constant dense<0.000000e+00> : vector<8xf32>
    %32 = vector.multi_reduction <add>, %8, %cst_24 [1] : vector<8x128xf32> to vector<8xf32>
    %33 = vector.shape_cast %32 : vector<8xf32> to vector<8x1xf32>
    %cst_25 = arith.constant 1.000000e+00 : f32
    %34 = vector.broadcast %cst_25 : f32 to vector<8x1xf32>
    %35 = arith.maximumf %33, %34 : vector<8x1xf32>
    %36 = math.rsqrt %35 : vector<8x1xf32>
    %37 = vector.broadcast %20 : vector<128x1xf32> to vector<128x64xf32>
    %38 = arith.mulf %37, %30 : vector<128x64xf32>
    %cst_26 = arith.constant dense<0.000000e+00> : vector<8x64xf32>
    %39 = tpu.matmul %8, %38, %cst_26 {dimension_numbers = #tpu.dot_dimension_numbers<[1], [0], [0], [1], [0, 0, 1, 1], [], []>} : vector<8x128xf32>, vector<128x64xf32>, vector<8x64xf32> -> vector<8x64xf32>
    %40 = vector.broadcast %36 : vector<8x1xf32> to vector<8x64xf32>
    %41 = arith.mulf %40, %39 : vector<8x64xf32>
    %c1 = arith.constant 1 : index
    %c0_27 = arith.constant 0 : index
    %c0_28 = arith.constant 0 : index
    %42 = vector.load %arg1[%c1, %c0_27, %c0_28] : memref<2x128x128xf32, #tpu.memory_space<vmem>>, vector<1x128x128xf32>
    %43 = vector.shape_cast %42 : vector<1x128x128xf32> to vector<128x128xf32>
    %c1_29 = arith.constant 1 : index
    %c0_30 = arith.constant 0 : index
    %c0_31 = arith.constant 0 : index
    %44 = vector.load %arg2[%c1_29, %c0_30, %c0_31] : memref<2x128x16xf32, #tpu.memory_space<vmem>>, vector<1x128x16xf32>
    %45 = vector.shape_cast %44 : vector<1x128x16xf32> to vector<128x16xf32>
    %c1_32 = arith.constant 1 : index
    %c0_33 = arith.constant 0 : index
    %c0_34 = arith.constant 0 : index
    %46 = vector.load %arg3[%c1_32, %c0_33, %c0_34] : memref<2x8x128xf32, #tpu.memory_space<vmem>>, vector<1x8x128xf32>
    %47 = vector.shape_cast %46 : vector<1x8x128xf32> to vector<8x128xf32>
    %c1_35 = arith.constant 1 : index
    %c0_36 = arith.constant 0 : index
    %c0_37 = arith.constant 0 : index
    %48 = vector.load %arg4[%c1_35, %c0_36, %c0_37] : memref<2x128x64xf32, #tpu.memory_space<vmem>>, vector<1x128x64xf32>
    %49 = vector.shape_cast %48 : vector<1x128x64xf32> to vector<128x64xf32>
    %cst_38 = arith.constant dense<0.000000e+00> : vector<128xf32>
    %50 = vector.multi_reduction <add>, %43, %cst_38 [1] : vector<128x128xf32> to vector<128xf32>
    %51 = vector.shape_cast %50 : vector<128xf32> to vector<128x1xf32>
    %cst_39 = arith.constant 1.000000e+00 : f32
    %52 = vector.broadcast %cst_39 : f32 to vector<128x1xf32>
    %53 = arith.maximumf %51, %52 : vector<128x1xf32>
    %54 = math.rsqrt %53 : vector<128x1xf32>
    %cst_40 = arith.constant dense<0.000000e+00> : vector<128xf32>
    %55 = vector.multi_reduction <add>, %45, %cst_40 [1] : vector<128x16xf32> to vector<128xf32>
    %56 = vector.shape_cast %55 : vector<128xf32> to vector<128x1xf32>
    %cst_41 = arith.constant 1.000000e+00 : f32
    %57 = vector.broadcast %cst_41 : f32 to vector<128x1xf32>
    %58 = arith.maximumf %56, %57 : vector<128x1xf32>
    %59 = math.rsqrt %58 : vector<128x1xf32>
    %60 = vector.broadcast %59 : vector<128x1xf32> to vector<128x64xf32>
    %61 = arith.mulf %60, %49 : vector<128x64xf32>
    %cst_42 = arith.constant dense<0.000000e+00> : vector<128x64xf32>
    %62 = tpu.matmul %43, %61, %cst_42 {dimension_numbers = #tpu.dot_dimension_numbers<[1], [0], [0], [1], [0, 0, 1, 1], [], []>} : vector<128x128xf32>, vector<128x64xf32>, vector<128x64xf32> -> vector<128x64xf32>
    %63 = vector.broadcast %54 : vector<128x1xf32> to vector<128x64xf32>
    %64 = arith.mulf %63, %62 : vector<128x64xf32>
    %cst_43 = arith.constant dense<0.000000e+00> : vector<128x64xf32>
    %65 = tpu.matmul %64, %0, %cst_43 {dimension_numbers = #tpu.dot_dimension_numbers<[1], [0], [0], [1], [0, 0, 1, 1], [], []>} : vector<128x64xf32>, vector<64x64xf32>, vector<128x64xf32> -> vector<128x64xf32>
    %66 = vector.broadcast %1 : vector<1x64xf32> to vector<128x64xf32>
    %67 = arith.addf %65, %66 : vector<128x64xf32>
    %cst_44 = arith.constant 0.000000e+00 : f32
    %68 = vector.broadcast %cst_44 : f32 to vector<128x64xf32>
    %69 = arith.maximumf %67, %68 : vector<128x64xf32>
    %cst_45 = arith.constant dense<0.000000e+00> : vector<8x64xf32>
    %70 = tpu.matmul %2, %69, %cst_45 {dimension_numbers = #tpu.dot_dimension_numbers<[1], [0], [0], [1], [0, 0, 1, 1], [], []>} : vector<8x128xf32>, vector<128x64xf32>, vector<8x64xf32> -> vector<8x64xf32>
    %cst_46 = arith.constant dense<0.000000e+00> : vector<8xf32>
    %71 = vector.multi_reduction <add>, %47, %cst_46 [1] : vector<8x128xf32> to vector<8xf32>
    %72 = vector.shape_cast %71 : vector<8xf32> to vector<8x1xf32>
    %cst_47 = arith.constant 1.000000e+00 : f32
    %73 = vector.broadcast %cst_47 : f32 to vector<8x1xf32>
    %74 = arith.maximumf %72, %73 : vector<8x1xf32>
    %75 = math.rsqrt %74 : vector<8x1xf32>
    %76 = vector.broadcast %59 : vector<128x1xf32> to vector<128x64xf32>
    %77 = arith.mulf %76, %69 : vector<128x64xf32>
    %cst_48 = arith.constant dense<0.000000e+00> : vector<8x64xf32>
    %78 = tpu.matmul %47, %77, %cst_48 {dimension_numbers = #tpu.dot_dimension_numbers<[1], [0], [0], [1], [0, 0, 1, 1], [], []>} : vector<8x128xf32>, vector<128x64xf32>, vector<8x64xf32> -> vector<8x64xf32>
    %79 = vector.broadcast %75 : vector<8x1xf32> to vector<8x64xf32>
    %80 = arith.mulf %79, %78 : vector<8x64xf32>
    %81 = tpu.concatenate %31, %70 in 0 : vector<8x64xf32>, vector<8x64xf32> -> vector<16x64xf32>
    %82 = tpu.concatenate %41, %80 in 0 : vector<8x64xf32>, vector<8x64xf32> -> vector<16x64xf32>
    %c0_49 = arith.constant 0 : index
    %c0_50 = arith.constant 0 : index
    %83 = vector.load %arg8[%c0_49, %c0_50] : memref<64x64xf32, #tpu.memory_space<vmem>>, vector<64x64xf32>
    %cst_51 = arith.constant dense<0.000000e+00> : vector<16x64xf32>
    %84 = tpu.matmul %82, %83, %cst_51 {dimension_numbers = #tpu.dot_dimension_numbers<[1], [0], [0], [1], [0, 0, 1, 1], [], []>} : vector<16x64xf32>, vector<64x64xf32>, vector<16x64xf32> -> vector<16x64xf32>
    %c0_52 = arith.constant 0 : index
    %c0_53 = arith.constant 0 : index
    %85 = vector.load %arg9[%c0_52, %c0_53] : memref<1x64xf32, #tpu.memory_space<vmem>>, vector<1x64xf32>
    %86 = vector.broadcast %85 : vector<1x64xf32> to vector<16x64xf32>
    %87 = arith.addf %84, %86 : vector<16x64xf32>
    %cst_54 = arith.constant 0.000000e+00 : f32
    %88 = vector.broadcast %cst_54 : f32 to vector<16x64xf32>
    %89 = arith.maximumf %87, %88 : vector<16x64xf32>
    %90 = arith.addf %81, %89 : vector<16x64xf32>
    %c0_55 = arith.constant 0 : index
    %c0_56 = arith.constant 0 : index
    %91 = vector.load %arg10[%c0_55, %c0_56] : memref<64x128xf32, #tpu.memory_space<vmem>>, vector<64x128xf32>
    %cst_57 = arith.constant dense<0.000000e+00> : vector<16x128xf32>
    %92 = tpu.matmul %90, %91, %cst_57 {dimension_numbers = #tpu.dot_dimension_numbers<[1], [0], [0], [1], [0, 0, 1, 1], [], []>} : vector<16x64xf32>, vector<64x128xf32>, vector<16x128xf32> -> vector<16x128xf32>
    %c0_58 = arith.constant 0 : index
    %c0_59 = arith.constant 0 : index
    %93 = vector.load %arg11[%c0_58, %c0_59] : memref<1x128xf32, #tpu.memory_space<vmem>>, vector<1x128xf32>
    %94 = vector.broadcast %93 : vector<1x128xf32> to vector<16x128xf32>
    %95 = arith.addf %92, %94 : vector<16x128xf32>
    %c0_60 = arith.constant 0 : index
    %c0_61 = arith.constant 0 : index
    %96 = vector.load %arg12[%c0_60, %c0_61] : memref<16x128xf32, #tpu.memory_space<vmem>>, vector<16x128xf32>
    tpu.vector_store %arg12[%c0_60, %c0_61], %95 {strides = array<i32>} : memref<16x128xf32, #tpu.memory_space<vmem>>, vector<16x128xf32>,
    return
  }
  func.func @transform_0(%arg0: i32) -> (i32, i32, i32) {
    %c0_i32 = arith.constant 0 : i32
    %c0_i32_0 = arith.constant 0 : i32
    %c0_i32_1 = arith.constant 0 : i32
    return %arg0, %c0_i32, %c0_i32_0 : i32, i32, i32
  }
  func.func @transform_1(%arg0: i32) -> (i32, i32, i32) {
    %c0_i32 = arith.constant 0 : i32
    %c0_i32_0 = arith.constant 0 : i32
    %c0_i32_1 = arith.constant 0 : i32
    return %arg0, %c0_i32, %c0_i32_0 : i32, i32, i32
  }
  func.func @transform_2(%arg0: i32) -> (i32, i32, i32) {
    %c0_i32 = arith.constant 0 : i32
    %c0_i32_0 = arith.constant 0 : i32
    %c0_i32_1 = arith.constant 0 : i32
    return %arg0, %c0_i32, %c0_i32_0 : i32, i32, i32
  }
  func.func @transform_3(%arg0: i32) -> (i32, i32, i32) {
    %c0_i32 = arith.constant 0 : i32
    %c0_i32_0 = arith.constant 0 : i32
    %c0_i32_1 = arith.constant 0 : i32
    return %arg0, %c0_i32, %c0_i32_0 : i32, i32, i32
  }
  func.func @transform_4(%arg0: i32) -> (i32, i32) {
    %c0_i32 = arith.constant 0 : i32
    %c0_i32_0 = arith.constant 0 : i32
    %c0_i32_1 = arith.constant 0 : i32
    return %c0_i32, %c0_i32_0 : i32, i32
  }
  func.func @transform_5(%arg0: i32) -> (i32, i32) {
    %c0_i32 = arith.constant 0 : i32
    %c0_i32_0 = arith.constant 0 : i32
    %c0_i32_1 = arith.constant 0 : i32
    return %c0_i32, %c0_i32_0 : i32, i32
  }
  func.func @transform_6(%arg0: i32) -> (i32, i32) {
    %c0_i32 = arith.constant 0 : i32
    %c0_i32_0 = arith.constant 0 : i32
    %c0_i32_1 = arith.constant 0 : i32
    return %c0_i32, %c0_i32_0 : i32, i32
  }
  func.func @transform_7(%arg0: i32) -> (i32, i32) {
    %c0_i32 = arith.constant 0 : i32
    %c0_i32_0 = arith.constant 0 : i32
    %c0_i32_1 = arith.constant 0 : i32
    return %c0_i32, %c0_i32_0 : i32, i32
  }
  func.func @transform_8(%arg0: i32) -> (i32, i32) {
    %c0_i32 = arith.constant 0 : i32
    %c0_i32_0 = arith.constant 0 : i32
    %c0_i32_1 = arith.constant 0 : i32
    return %c0_i32, %c0_i32_0 : i32, i32
  }
  func.func @transform_9(%arg0: i32) -> (i32, i32) {
    %c0_i32 = arith.constant 0 : i32
    %c0_i32_0 = arith.constant 0 : i32
    %c0_i32_1 = arith.constant 0 : i32
    return %c0_i32, %c0_i32_0 : i32, i32
  }
  func.func @transform_10(%arg0: i32) -> (i32, i32) {
    %c0_i32 = arith.constant 0 : i32
    %c0_i32_0 = arith.constant 0 : i32
    %c0_i32_1 = arith.constant 0 : i32
    return %c0_i32, %c0_i32_0 : i32, i32
  }
  func.func @transform_11(%arg0: i32) -> (i32, i32) {
    %c0_i32 = arith.constant 0 : i32
    %c0_i32_0 = arith.constant 0 : i32
    return %arg0, %c0_i32 : i32, i32
  }
}

</mosaic_0001>

<bundles_post_ra>
// kernel: tpu_custom_call.1
= control target key start
LH: loop header
LB: loop body
LE: loop exit
PB: predicated region body
PF: predicated region fallthrough
CT: control target
= control target key end

     0   :  { %s4254_s0 = inlined_call_operand.vmem [shape: f32[4,128,128], index: 0, kind: input, shape index: {}]   ;;  %s4255_s1 = inlined_call_operand.vmem [shape: f32[4,128,16], index: 1, kind: input, shape index: {}]   ;;  %s4256_s2 = inlined_call_operand.vmem [shape: f32[4,8,128], index: 2, kind: input, shape index: {}]   ;;  %s4257_s3 = inlined_call_operand.vmem [shape: f32[4,128,64], index: 3, kind: input, shape index: {}]   ;;  %s4258_s4 = inlined_call_operand.vmem [shape: f32[8,128], index: 4, kind: input, shape index: {}]   ;;  %s4259_s5 = inlined_call_operand.vmem [shape: f32[64,64], index: 5, kind: input, shape index: {}]   ;;  %s4260_s6 = inlined_call_operand.vmem [shape: f32[1,64], index: 6, kind: input, shape index: {}]   ;;  %s4261_s7 = inlined_call_operand.vmem [shape: f32[64,64], index: 7, kind: input, shape index: {}]   ;;  %s4262_s8 = inlined_call_operand.vmem [shape: f32[1,64], index: 8, kind: input, shape index: {}]   ;;  %s4263_s9 = inlined_call_operand.vmem [shape: f32[64,128], index: 9, kind: input, shape index: {}]   ;;  %s4264_s10 = inlined_call_operand.vmem [shape: f32[1,128], index: 10, kind: input, shape index: {}]   ;;  %s4265_s11 = inlined_call_operand.hbm [shape: f32[32,128], index: 11, kind: output, shape index: {}]  }
   0x1   :  { %4267 = sst [smem:[#allocation7_spill]] %s4254_s0 }
   0x2   :  { %4268 = sst [smem:[#allocation8_spill]] %s4255_s1 }
   0x3   :  { %16 = vsyncpa [#allocation3], 0 }
   0x4   :  { %18 = vsyncpa [#allocation3 + $0x1], 0  ;;  %s3488_s17 = smov 0   ;;  %s3490_s18 = smov 0  }
   0x5   :  { %s3492_s19 = smov 0   ;;  %s3494_s20 = smov 0  }
   0x6 LB: > { %4269 = sst [smem:[#allocation5_spill]] %s3416_s19  ;;  %s3509_s21 = sadd.s32 4294967295, %s3420_s20   ;;  %s3420_s20 = sphi %s3494_s20, %s4279_s20   ;;  %s3416_s19 = sphi %s3492_s19, %s4276_s19   ;;  %s3412_s18 = sphi %s3490_s18, %s4278_s18   ;;  %s3408_s17 = sphi %s3488_s17, %s4277_s17  }
   0x7   : > { %s2275_s22 = sadd.s32 4294967294, %s3420_s20   ;;  %s3513_s23 = sadd.s32 1, %s3420_s20  }
   0x8   : > { %s282_s24 = sadd.s32 1, %s3416_s19  ;;  %s279_s25 = ssub.s32 %s3420_s20, %s3513_s23 }
   0x9   : > { %p292_p0 = scmp.ne.s32.totalorder %s3416_s19, %s3412_s18  ;;  %p280_p1 = scmp.eq.s32.totalorder %s279_s25, 0 }
   0xa   : > { %p293_p2 = scmp.eq.s32.totalorder %s3509_s21, 1  ;;  %p298_p3 = scmp.ne.s32.totalorder %s3412_s18, %s3408_s17 }
   0xb   : > { %p299_p4 = scmp.eq.s32.totalorder %s2275_s22, 1  ;;  %p2278_p7 = scmp.ge.s32.totalorder %s3420_s20, 1 }
   0xc   : > { %s3524_s26 = scalar_select %p280_p1, %s3416_s19, %s282_s24  }
   0xd   : > { %p3526_p5 = por %p293_p2, %p292_p0  ;;  %p3530_p6 = por %p299_p4, %p298_p3 }
   0xe   : > { %4270 = sst [smem:[#allocation6_spill]] %s3524_s26  ;;  %p377_p8 = scmp.lt.s32.totalorder %s3420_s20, 3 }
  0x10   : > { %p378_p9 = pnand %p2278_p7, %p377_p8 }
  0x11   : > { %s2280_s29 = sshll.u32 (!%p378_p9), %s3509_s21, 1  ;;  %vm586_vm0 = vcmask (!%p378_p9), 130048   ;;  %s4273_s1 = sld [smem:[#allocation8_spill]] (!%p378_p9)  ;;  %v463_v48 = vld [vmem:[%s4259_s5] sm:$0xff] (!%p378_p9)  ;;  %v464_v49 = vld [vmem:[%s4259_s5 + $0x8] sm:$0xff] (!%p378_p9)  ;;  %v465_v50 = vld [vmem:[%s4259_s5 + $0x10] sm:$0xff] (!%p378_p9) }
  0x12   : > { %381 = sbr.rel (%p378_p9) target bundleno = 1856 (0x740), region = 64  ;;  %p436_p10 = scmp.lt.s32.totalorder (!%p378_p9), %s2280_s29, 3  ;;  %v3656_v51 = vpack.c.bf16 (!%p378_p9), %v464_v49, %v463_v48  ;;  %v466_v52 = vld [vmem:[%s4259_s5 + $0x18] sm:$0xff] (!%p378_p9)  ;;  %v467_v54 = vld [vmem:[%s4259_s5 + $0x20] sm:$0xff] (!%p378_p9)  ;;  %v468_v55 = vld [vmem:[%s4259_s5 + $0x28] sm:$0xff] (!%p378_p9)  ;;  %vm850_vm1 = vcmask (!%p378_p9), 523264  }
  0x13   : > { %s4274_s0 = sld [smem:[#allocation7_spill]] (!%p378_p9)  ;;  %v3661_v53 = vpack.c.bf16 (!%p378_p9), %v466_v52, %v465_v50  ;;  %v3672_v56 = vpack.c.bf16 (!%p378_p9), %v468_v55, %v467_v54  ;;  %vm3423_vm2 = vmmov (!%p378_p9), 0  }
  0x14   : > { %2991 = vmatprep.subr.bf16.mxu1 (!%p378_p9), %v3656_v51 }
  0x15   : > { %2993 = vmatpush3.bf16.msra.mxu1 (!%p378_p9), %v3656_v51 }
  0x16   : > { %2995 = vmatprep.subr.bf16.mxu1 (!%p378_p9), %v3661_v53 }
  0x19   : > { %s4281_s29 = smov (!%p436_p10, %s2280_s29), 3  ;;  %2997 = vmatpush3.bf16.msra.mxu1 %v3661_v53 }
  0x1a   : > { %s3540_s30 = sshll.u32 %s4281_s29, 7  ;;  %2999 = vmatprep.subr.bf16.mxu1 %v3672_v56  ;;  %s2287_s24 = sshll.u32 %s4281_s29, 3 }
  0x1b   : > { %s3546_s14 = scalar_lea.vmem %s4273_s1, %s3540_s30  ;;  %s3584_s22 = scalar_lea.vmem %s4274_s0, %s3540_s30 }
  0x1c   : > { %v491_v0 = vld [vmem:[%s3546_s14 + $0x10] sm:$0xff]  ;;  %v489_v1 = vld [vmem:[%s3546_s14] sm:$0xff]  ;;  %v492_v2 = vld [vmem:[%s3546_s14 + $0x18] sm:$0xff]  ;;  %s3681_s19 = scalar_lea.vmem %s4257_s3, %s3540_s30  ;;  %s4059_s1 = scalar_lea.vmem %s4256_s2, %s2287_s24 }
  0x1d   : > { %v593_v3 = vsel %vm586_vm0, %v491_v0, 0.0  ;;  %v587_v4 = vsel %vm586_vm0, %v489_v1, 0.0  ;;  %v490_v5 = vld [vmem:[%s3546_s14 + $0x8] sm:$0xff]  ;;  %v596_v6 = vsel %vm586_vm0, %v492_v2, 0.0  ;;  %v493_v9 = vld [vmem:[%s3546_s14 + $0x20] sm:$0xff]  ;;  %v496_v12 = vld [vmem:[%s3546_s14 + $0x38] sm:$0xff]  ;;  %3001 = vmatpush3.bf16.msra.mxu1 %v3672_v56 }
  0x1e   : > { %594 = vadd.xlane.f32.xlu1 %v593_v3  ;;  %588 = vadd.xlane.f32.xlu0 %v587_v4  ;;  %v590_v7 = vsel %vm586_vm0, %v490_v5, 0.0  ;;  %v494_v8 = vld [vmem:[%s3546_s14 + $0x28] sm:$0xff]  ;;  %v599_v11 = vsel %vm586_vm0, %v493_v9, 0.0  ;;  %v495_v13 = vld [vmem:[%s3546_s14 + $0x30] sm:$0xff]  ;;  %v608_v14 = vsel %vm586_vm0, %v496_v12, 0.0  ;;  %v497_v17 = vld [vmem:[%s3546_s14 + $0x40] sm:$0xff] }
  0x1f   : > { %v602_v10 = vsel %vm586_vm0, %v494_v8, 0.0  ;;  %v605_v15 = vsel %vm586_vm0, %v495_v13, 0.0  ;;  %v498_v16 = vld [vmem:[%s3546_s14 + $0x48] sm:$0xff]  ;;  %v611_v19 = vsel %vm586_vm0, %v497_v17, 0.0  ;;  %v500_v20 = vld [vmem:[%s3546_s14 + $0x58] sm:$0xff]  ;;  %v499_v21 = vld [vmem:[%s3546_s14 + $0x50] sm:$0xff] }
  0x20   : > { %v614_v18 = vsel %vm586_vm0, %v498_v16, 0.0  ;;  %v620_v22 = vsel %vm586_vm0, %v500_v20, 0.0  ;;  %v617_v23 = vsel %vm586_vm0, %v499_v21, 0.0  ;;  %v502_v24 = vld [vmem:[%s3546_s14 + $0x68] sm:$0xff]  ;;  %v501_v25 = vld [vmem:[%s3546_s14 + $0x60] sm:$0xff]  ;;  %v504_v28 = vld [vmem:[%s3546_s14 + $0x78] sm:$0xff] }
  0x21   : > { %v626_v26 = vsel %vm586_vm0, %v502_v24, 0.0  ;;  %v623_v27 = vsel %vm586_vm0, %v501_v25, 0.0  ;;  %v503_v29 = vld [vmem:[%s3546_s14 + $0x70] sm:$0xff]  ;;  %v632_v30 = vsel %vm586_vm0, %v504_v28, 0.0  ;;  %v473_v32 = vld [vmem:[%s3584_s22] sm:$0xff]  ;;  %v3588_v33 = vld [vmem:[%s3584_s22 + $0x8] sm:$0xff] }
  0x22   : > { %597 = vadd.xlane.f32.xlu1 %v596_v6  ;;  %591 = vadd.xlane.f32.xlu0 %v590_v7  ;;  %v629_v31 = vsel %vm586_vm0, %v503_v29, 0.0  ;;  %v3592_v34 = vld [vmem:[%s3584_s22 + $0x18] sm:$0xff]  ;;  %v3595_v35 = vld [vmem:[%s3584_s22 + $0x10] sm:$0xff]  ;;  %v3600_v36 = vld [vmem:[%s3584_s22 + $0x28] sm:$0xff]  ;;  %s2387_s0 = sshll.u32 %s3509_s21, 8  ;;  %s3425_s21 = smov [#allocation2]  }
  0x23   : > { %2620 = vmatprep.mubr.f32.mxu0 %v473_v32  ;;  %v3603_v37 = vld [vmem:[%s3584_s22 + $0x20] sm:$0xff]  ;;  %v3608_v38 = vld [vmem:[%s3584_s22 + $0x38] sm:$0xff]  ;;  %v3611_v39 = vld [vmem:[%s3584_s22 + $0x30] sm:$0xff]  ;;  %s3362_s12 = sshll.u32 %s3425_s21, 4  ;;  %s3363_s12 = int_to_ptr.vmem [resolvable:$false] %s3362_s12 }
  0x24   : > { %v3616_v40 = vld [vmem:[%s3584_s22 + $0x48] sm:$0xff]  ;;  %v3619_v41 = vld [vmem:[%s3584_s22 + $0x40] sm:$0xff]  ;;  %v3624_v42 = vld [vmem:[%s3584_s22 + $0x58] sm:$0xff]  ;;  %s3364_s13 = scalar_lea.vmem %s3363_s12, 512 }
  0x25   : > { %v3627_v43 = vld [vmem:[%s3584_s22 + $0x50] sm:$0xff]  ;;  %v3632_v44 = vld [vmem:[%s3584_s22 + $0x68] sm:$0xff]  ;;  %v3635_v45 = vld [vmem:[%s3584_s22 + $0x60] sm:$0xff] }
  0x26   : > { %603 = vadd.xlane.f32.xlu1 %v602_v10  ;;  %600 = vadd.xlane.f32.xlu0 %v599_v11  ;;  %v3640_v46 = vld [vmem:[%s3584_s22 + $0x78] sm:$0xff]  ;;  %v3643_v47 = vld [vmem:[%s3584_s22 + $0x70] sm:$0xff]  ;;  %v511_v25 = vld [vmem:[%s3681_s19 + $0x28] sm:$0xff] }
  0x27   : > { %v508_v10 = vld [vmem:[%s3681_s19 + $0x10] sm:$0xff]  ;;  %v509_v16 = vld [vmem:[%s3681_s19 + $0x18] sm:$0xff]  ;;  %v510_v28 = vld [vmem:[%s3681_s19 + $0x20] sm:$0xff] }
  0x28   : > { %v513_v54 = vld [vmem:[%s3681_s19 + $0x38] sm:$0xff] }
  0x2a   : > { %609 = vadd.xlane.f32.xlu1 %v608_v14  ;;  %606 = vadd.xlane.f32.xlu0 %v605_v15  ;;  %v506_v14 = vld [vmem:[%s3681_s19] sm:$0xff]  ;;  %v507_v15 = vld [vmem:[%s3681_s19 + $0x8] sm:$0xff] }
  0x2e   : > { %615 = vadd.xlane.f32.xlu1 %v614_v18  ;;  %612 = vadd.xlane.f32.xlu0 %v611_v19 }
  0x32   : > { %621 = vadd.xlane.f32.xlu1 %v620_v22  ;;  %618 = vadd.xlane.f32.xlu0 %v617_v23 }
  0x36   : > { %627 = vadd.xlane.f32.xlu1 %v626_v26  ;;  %624 = vadd.xlane.f32.xlu0 %v623_v27 }
  0x3a   : > { %633 = vadd.xlane.f32.xlu1 %v632_v30  ;;  %630 = vadd.xlane.f32.xlu0 %v629_v31 }
  0x3e   : > { %524 = vadd.xlane.f32.xlu1 %v3588_v33  ;;  %522 = vadd.xlane.f32.xlu0 %v473_v32 }
  0x42   : > { %528 = vadd.xlane.f32.xlu1 %v3592_v34  ;;  %526 = vadd.xlane.f32.xlu0 %v3595_v35 }
  0x46   : > { %532 = vadd.xlane.f32.xlu1 %v3600_v36  ;;  %530 = vadd.xlane.f32.xlu0 %v3603_v37 }
  0x4a   : > { %536 = vadd.xlane.f32.xlu1 %v3608_v38  ;;  %534 = vadd.xlane.f32.xlu0 %v3611_v39 }
  0x4e   : > { %540 = vadd.xlane.f32.xlu1 %v3616_v40  ;;  %538 = vadd.xlane.f32.xlu0 %v3619_v41 }
  0x52   : > { %544 = vadd.xlane.f32.xlu1 %v3624_v42  ;;  %542 = vadd.xlane.f32.xlu0 %v3627_v43 }
  0x56   : > { %548 = vadd.xlane.f32.xlu1 %v3632_v44  ;;  %546 = vadd.xlane.f32.xlu0 %v3635_v45 }
  0x5a   : > { %552 = vadd.xlane.f32.xlu1 %v3640_v46  ;;  %550 = vadd.xlane.f32.xlu0 %v3643_v47 }
  0xab   : > { %v595_v57 = vpop.xlane.xlu1 %594  ;;  %v589_v58 = vpop.xlane.xlu0 %588 }
  0xac   : > { %v637_v59 = vmax.f32 %v595_v57, 1.0  ;;  %v635_v60 = vmax.f32 %v589_v58, 1.0  ;;  %v512_v58 = vld [vmem:[%s3681_s19 + $0x30] sm:$0xff] }
  0xae   : > { %3226 = vrsqrt.f32 %v637_v59 }
  0xaf   : > { %v598_v61 = vpop.xlane.xlu1 %597  ;;  %v592_v62 = vpop.xlane.xlu0 %591  ;;  %3228 = vrsqrt.f32 %v635_v60 }
  0xb0   : > { %v638_v63 = vmax.f32 %v598_v61, 1.0  ;;  %v636_v0 = vmax.f32 %v592_v62, 1.0 }
  0xb2   : > { %3230 = vrsqrt.f32 %v638_v63 }
  0xb3   : > { %3232 = vrsqrt.f32 %v636_v0  ;;  %v604_v1 = vpop.xlane.xlu1 %603  ;;  %v601_v2 = vpop.xlane.xlu0 %600 }
  0xb4   : > { %v640_v3 = vmax.f32 %v604_v1, 1.0  ;;  %v639_v4 = vmax.f32 %v601_v2, 1.0  ;;  %v515_v2 = vld [vmem:[%s3681_s19 + $0x48] sm:$0xff] }
  0xb6   : > { %3234 = vrsqrt.f32 %v640_v3 }
  0xb7   : > { %3236 = vrsqrt.f32 %v639_v4  ;;  %v610_v5 = vpop.xlane.xlu1 %609  ;;  %v607_v6 = vpop.xlane.xlu0 %606 }
  0xb8   : > { %v642_v7 = vmax.f32 %v610_v5, 1.0  ;;  %v641_v8 = vmax.f32 %v607_v6, 1.0  ;;  %v3683_v9 = vpop.eup %3226  ;;  %v514_v5 = vld [vmem:[%s3681_s19 + $0x40] sm:$0xff] }
  0xb9   : > { %v3686_v11 = vpop.eup %3228  ;;  %v669_v21 = vmul.f32 %v3683_v9, %v508_v10 }
  0xba   : > { %3238 = vrsqrt.f32 %v642_v7  ;;  %v667_v22 = vmul.f32 %v3686_v11, %v506_v14 }
  0xbb   : > { %3240 = vrsqrt.f32 %v641_v8  ;;  %v616_v12 = vpop.xlane.xlu1 %615  ;;  %v613_v13 = vpop.xlane.xlu0 %612 }
  0xbc   : > { %v3691_v17 = vpop.eup %3230  ;;  %v644_v18 = vmax.f32 %v616_v12, 1.0  ;;  %v643_v19 = vmax.f32 %v613_v13, 1.0 }
  0xbd   : > { %v3693_v20 = vpop.eup %3232  ;;  %v670_v24 = vmul.f32 %v3691_v17, %v509_v16  ;;  %v516_v16 = vld [vmem:[%s3681_s19 + $0x50] sm:$0xff] }
  0xbe   : > { %3242 = vrsqrt.f32 %v644_v18  ;;  %v668_v23 = vmul.f32 %v3693_v20, %v507_v15  ;;  %v517_v15 = vld [vmem:[%s3681_s19 + $0x58] sm:$0xff] }
  0xbf   : > { %3244 = vrsqrt.f32 %v643_v19  ;;  %v622_v26 = vpop.xlane.xlu1 %621  ;;  %v619_v27 = vpop.xlane.xlu0 %618  ;;  %v2962_v50 = vpack.c.bf16 %v670_v24, %v669_v21  ;;  %v519_v24 = vld [vmem:[%s3681_s19 + $0x68] sm:$0xff] }
  0xc0   : > { %v3701_v29 = vpop.eup %3234  ;;  %v2958_v30 = vpack.c.bf16 %v668_v23, %v667_v22  ;;  %v646_v31 = vmax.f32 %v622_v26, 1.0  ;;  %v645_v32 = vmax.f32 %v619_v27, 1.0 }
  0xc1   : > { %v3703_v48 = vpop.eup %3236  ;;  %v672_v49 = vmul.f32 %v3701_v29, %v511_v25  ;;  %v518_v25 = vld [vmem:[%s3681_s19 + $0x60] sm:$0xff] }
  0xc2   : > { %2959 = vmatprep.subr.bf16.mxu0 %v2958_v30  ;;  %3246 = vrsqrt.f32 %v646_v31  ;;  %v671_v52 = vmul.f32 %v3703_v48, %v510_v28 }
  0xc3   : > { %2961 = vmatpush3.bf16.msra.mxu0 %v2958_v30  ;;  %3248 = vrsqrt.f32 %v645_v32  ;;  %v628_v55 = vpop.xlane.xlu1 %627  ;;  %v625_v57 = vpop.xlane.xlu0 %624  ;;  %v521_v32 = vld [vmem:[%s3681_s19 + $0x78] sm:$0xff] }
  0xc4   : > { %v3709_v59 = vpop.eup %3238  ;;  %2963 = vmatprep.subr.bf16.mxu0 %v2962_v50  ;;  %v648_v60 = vmax.f32 %v628_v55, 1.0  ;;  %v647_v61 = vmax.f32 %v625_v57, 1.0  ;;  %v2966_v62 = vpack.c.bf16 %v672_v49, %v671_v52  ;;  %v520_v49 = vld [vmem:[%s3681_s19 + $0x70] sm:$0xff] }
  0xc5   : > { %v3711_v63 = vpop.eup %3240  ;;  %v674_v0 = vmul.f32 %v3709_v59, %v513_v54 }
  0xc6   : > { %3250 = vrsqrt.f32 %v648_v60  ;;  %v673_v1 = vmul.f32 %v3711_v63, %v512_v58  ;;  %v2331_v60 = vld [vmem:[%s3546_s14 + $0xb8] sm:$0xff] }
  0xc7   : > { %2965 = vmatpush3.bf16.msra.mxu0 %v2962_v50  ;;  %3252 = vrsqrt.f32 %v647_v61  ;;  %v634_v3 = vpop.xlane.xlu1 %633  ;;  %v631_v4 = vpop.xlane.xlu0 %630  ;;  %v2330_v61 = vld [vmem:[%s3546_s14 + $0xb0] sm:$0xff] }
  0xc8   : > { %v3717_v6 = vpop.eup %3242  ;;  %2967 = vmatprep.subr.bf16.mxu0 %v2966_v62  ;;  %v650_v7 = vmax.f32 %v634_v3, 1.0  ;;  %v649_v8 = vmax.f32 %v631_v4, 1.0  ;;  %v2970_v10 = vpack.c.bf16 %v674_v0, %v673_v1  ;;  %v1356_v0 = vsel %vm586_vm0, %v2330_v61, 0.0  ;;  %v2333_v1 = vld [vmem:[%s3546_s14 + $0xc8] sm:$0xff] }
  0xc9   : > { %v3719_v12 = vpop.eup %3244  ;;  %v676_v13 = vmul.f32 %v3717_v6, %v515_v2  ;;  %v2332_v2 = vld [vmem:[%s3546_s14 + $0xc0] sm:$0xff]  ;;  %v1365_v3 = vsel %vm586_vm0, %v2333_v1, 0.0 }
  0xca   : > { %3254 = vrsqrt.f32 %v650_v7  ;;  %v675_v14 = vmul.f32 %v3719_v12, %v514_v5  ;;  %v1362_v4 = vsel %vm586_vm0, %v2332_v2, 0.0  ;;  %v2335_v5 = vld [vmem:[%s3546_s14 + $0xd8] sm:$0xff]  ;;  %v2334_v7 = vld [vmem:[%s3546_s14 + $0xd0] sm:$0xff] }
  0xcb   : > { %2969 = vmatpush3.bf16.msra.mxu0 %v2966_v62  ;;  %3256 = vrsqrt.f32 %v649_v8  ;;  %v1359_v62 = vsel %vm586_vm0, %v2331_v60, 0.0  ;;  %v1371_v8 = vsel %vm586_vm0, %v2335_v5, 0.0 }
  0xcc   : > { %v3725_v18 = vpop.eup %3246  ;;  %2971 = vmatprep.subr.bf16.mxu0 %v2970_v10  ;;  %v2974_v19 = vpack.c.bf16 %v676_v13, %v675_v14  ;;  %v2337_v13 = vld [vmem:[%s3546_s14 + $0xe8] sm:$0xff]  ;;  %v2336_v14 = vld [vmem:[%s3546_s14 + $0xe0] sm:$0xff] }
  0xcd   : > { %v3727_v21 = vpop.eup %3248  ;;  %v678_v22 = vmul.f32 %v3725_v18, %v517_v15  ;;  %v1377_v15 = vsel %vm586_vm0, %v2337_v13, 0.0 }
  0xce   : > { %v677_v23 = vmul.f32 %v3727_v21, %v516_v16  ;;  %v1374_v16 = vsel %vm586_vm0, %v2336_v14, 0.0 }
  0xcf   : > { %2973 = vmatpush3.bf16.msra.mxu0 %v2970_v10  ;;  %v1368_v10 = vsel %vm586_vm0, %v2334_v7, 0.0 }
  0xd0   : > { %v3733_v26 = vpop.eup %3250  ;;  %2975 = vmatprep.subr.bf16.mxu0 %v2974_v19  ;;  %v2978_v27 = vpack.c.bf16 %v678_v22, %v677_v23  ;;  %v2338_v22 = vld [vmem:[%s3546_s14 + $0xf0] sm:$0xff] }
  0xd1   : > { %v3735_v28 = vpop.eup %3252  ;;  %v680_v30 = vmul.f32 %v3733_v26, %v519_v24  ;;  %v1380_v24 = vsel %vm586_vm0, %v2338_v22, 0.0 }
  0xd2   : > { %v679_v31 = vmul.f32 %v3735_v28, %v518_v25  ;;  %v523_v25 = vpop.xlane.xlu0 %522 }
  0xd3   : > { %2977 = vmatpush3.bf16.msra.mxu0 %v2974_v19  ;;  %v2339_v19 = vld [vmem:[%s3546_s14 + $0xf8] sm:$0xff] }
  0xd4   : > { %v3741_v50 = vpop.eup %3254  ;;  %2979 = vmatprep.subr.bf16.mxu0 %v2978_v27  ;;  %v2982_v52 = vpack.c.bf16 %v680_v30, %v679_v31  ;;  %v1383_v23 = vsel %vm586_vm0, %v2339_v19, 0.0 }
  0xd5   : > { %v3743_v54 = vpop.eup %3256  ;;  %v682_v55 = vmul.f32 %v3741_v50, %v521_v32 }
  0xd6   : > { %v681_v57 = vmul.f32 %v3743_v54, %v520_v49  ;;  %v527_v30 = vpop.xlane.xlu0 %526 }
  0xd7   : > { %2981 = vmatpush3.bf16.msra.mxu0 %v2978_v27  ;;  %v525_v27 = vpop.xlane.xlu1 %524 }
  0xd8   : > { %2983 = vmatprep.subr.bf16.mxu0 %v2982_v52  ;;  %v2986_v58 = vpack.c.bf16 %v682_v55, %v681_v57  ;;  %v555_v55 = vmax.f32 %v525_v27, 1.0 }
  0xda   : > { %v531_v32 = vpop.xlane.xlu0 %530 }
  0xdb   : > { %2985 = vmatpush3.bf16.msra.mxu0 %v2982_v52  ;;  %v529_v31 = vpop.xlane.xlu1 %528  ;;  %v554_v52 = vmax.f32 %v523_v25, 1.0 }
  0xdc   : > { %2987 = vmatprep.subr.bf16.mxu0 %v2986_v58 }
  0xdd   : > { %3258 = vrsqrt.f32 %v554_v52 }
  0xde   : > { %v535_v57 = vpop.xlane.xlu0 %534  ;;  %3260 = vrsqrt.f32 %v555_v55 }
  0xdf   : > { %2989 = vmatpush3.bf16.msra.mxu0 %v2986_v58  ;;  %v533_v49 = vpop.xlane.xlu1 %532 }
  0xe2   : > { %2621 = vmatmul.mubr.f32.vlgmr.msra.gmra.mrb[0].mxu0 %v3588_v33  ;;  %v469_v33 = vld [vmem:[%s4259_s5 + $0x30] sm:$0xff] }
  0xe3   : > { %2623 = vmatprep.mubr.f32.mxu0 %v3595_v35  ;;  %v537_v58 = vpop.xlane.xlu1 %536 }
  0xe6   : > { %2624 = vmatmul.mubr.f32.gmra.mrb[2].mxu0 %v3592_v34  ;;  %v470_v34 = vld [vmem:[%s4259_s5 + $0x38] sm:$0xff] }
  0xe7   : > { %2626 = vmatprep.mubr.f32.mxu0 %v3603_v37  ;;  %v3768_v35 = vpack.c.bf16 %v470_v34, %v469_v33  ;;  %v2324_v37 = vld [vmem:[%s3546_s14 + $0x80] sm:$0xff]  ;;  %v556_v33 = vmax.f32 %v527_v30, 1.0  ;;  %v557_v34 = vmax.f32 %v529_v31, 1.0 }
  0xe9   : > { %3003 = vmatprep.subr.bf16.mxu1 %v3768_v35  ;;  %3262 = vrsqrt.f32 %v556_v33 }
  0xea   : > { %2627 = vmatmul.mubr.f32.gmra.mrb[4].mxu0 %v3600_v36  ;;  %3005 = vmatpush3.bf16.msra.mxu1 %v3768_v35  ;;  %v2325_v36 = vld [vmem:[%s3546_s14 + $0x88] sm:$0xff]  ;;  %3264 = vrsqrt.f32 %v557_v34 }
  0xeb   : > { %2629 = vmatprep.mubr.f32.mxu0 %v3611_v39  ;;  %v1341_v39 = vsel %vm586_vm0, %v2325_v36, 0.0  ;;  %v539_v36 = vpop.xlane.xlu0 %538 }
  0xec   : > { %1342 = vadd.xlane.f32.xlu1 %v1341_v39  ;;  %v559_v39 = vmax.f32 %v533_v49, 1.0  ;;  %v562_v60 = vmax.f32 %v539_v36, 1.0 }
  0xee   : > { %2630 = vmatmul.mubr.f32.gmra.mrb[6].mxu0 %v3608_v38  ;;  %v2327_v38 = vld [vmem:[%s3546_s14 + $0x98] sm:$0xff] }
  0xef   : > { %2632 = vmatprep.mubr.f32.mxu0 %v3619_v41  ;;  %v2326_v41 = vld [vmem:[%s3546_s14 + $0x90] sm:$0xff] }
  0xf2   : > { %2633 = vmatmul.mubr.f32.gmra.mrb[8].mxu0 %v3616_v40  ;;  %v1338_v40 = vsel %vm586_vm0, %v2324_v37, 0.0  ;;  %v558_v37 = vmax.f32 %v531_v32, 1.0 }
  0xf3   : > { %2635 = vmatprep.mubr.f32.mxu0 %v3627_v43  ;;  %1339 = vadd.xlane.f32.xlu0 %v1338_v40  ;;  %v1344_v43 = vsel %vm586_vm0, %v2326_v41, 0.0  ;;  %v560_v40 = vmax.f32 %v535_v57, 1.0  ;;  %v561_v41 = vmax.f32 %v537_v58, 1.0 }
  0xf4   : > { %3266 = vrsqrt.f32 %v558_v37 }
  0xf5   : > { %3268 = vrsqrt.f32 %v559_v39 }
  0xf6   : > { %2636 = vmatmul.mubr.f32.gmra.mrb[10].mxu0 %v3624_v42  ;;  %v1347_v42 = vsel %vm586_vm0, %v2327_v38, 0.0  ;;  %v541_v38 = vpop.xlane.xlu1 %540  ;;  %3270 = vrsqrt.f32 %v560_v40 }
  0xf7   : > { %2638 = vmatprep.mubr.f32.mxu0 %v3635_v45  ;;  %v2328_v45 = vld [vmem:[%s3546_s14 + $0xa0] sm:$0xff]  ;;  %1348 = vadd.xlane.f32.xlu1 %v1347_v42  ;;  %v543_v42 = vpop.xlane.xlu0 %542  ;;  %3272 = vrsqrt.f32 %v561_v41 }
  0xf8   : > { %1345 = vadd.xlane.f32.xlu0 %v1344_v43  ;;  %v3259_v43 = vpop.eup %3258  ;;  %3274 = vrsqrt.f32 %v562_v60  ;;  %v564_v7 = vmax.f32 %v543_v42, 1.0 }
  0xfa   : > { %2639 = vmatmul.mubr.f32.gmra.mrb[12].mxu0 %v3632_v44  ;;  %v2329_v44 = vld [vmem:[%s3546_s14 + $0xa8] sm:$0xff]  ;;  %s432_s14 = sand.u32 1, %s3412_s18  }
  0xfb   : > { %2641 = vmatprep.mubr.f32.mxu0 %v3643_v47  ;;  %v1350_v47 = vsel %vm586_vm0, %v2328_v45, 0.0  ;;  %v3261_v45 = vpop.eup %3260  ;;  %s2279_s15 = sshll.u32 %s432_s14, 4  ;;  %s4213_s26 = scalar_lea.sflag [#allocation3], %s432_s14 }
  0xfc   : > { %1351 = vadd.xlane.f32.xlu0 %v1350_v47  ;;  %s434_s24 = scalar_lea.vmem [#allocation2], %s2279_s15 }
  0xfd   : > { %s2177_s25 = sshll.u32 %s434_s24, 4  ;;  %s4206_s25 = int_to_ptr.vmem [resolvable:$true] %s2177_s25 }
  0xfe   : > { %2642 = vmatmul.mubr.f32.gmra.mrb[14].mxu0 %v3640_v46  ;;  %v1353_v46 = vsel %vm586_vm0, %v2329_v44, 0.0  ;;  %v545_v44 = vpop.xlane.xlu1 %544  ;;  %s3358_s30 = scalar_lea.vmem %s4206_s25, 256  ;;  %p3365_p0 = scmp.lt.s32.totalorder %s4206_s25, %s3363_s12 }
  0xff   : > { %1354 = vadd.xlane.f32.xlu1 %v1353_v46  ;;  %v565_v13 = vmax.f32 %v545_v44, 1.0  ;;  %p3359_p11 = scmp.ne.s32.totalorder %s4206_s25, %s3358_s30  ;;  %p3366_p1 = scmp.lt.s32.totalorder %s3364_s13, %s3358_s30 }
 0x100   : > { %1357 = vadd.xlane.f32.xlu0 %v1356_v0  ;;  %v3263_v0 = vpop.eup %3262 }
 0x101   : > { %v3265_v2 = vpop.eup %3264  ;;  %p3360_p12 = pnand %p3359_p11, %p3526_p5  ;;  %p3367_p2 = por %p3366_p1, %p3365_p0 }
 0x102   : > { %v3267_v14 = vpop.eup %3266 }
 0x103   : > { %1360 = vadd.xlane.f32.xlu1 %v1359_v62  ;;  %v563_v62 = vmax.f32 %v541_v38, 1.0  ;;  %p3361_p13 = pneg %p3360_p12 }
 0x104   : > { %1363 = vadd.xlane.f32.xlu0 %v1362_v4  ;;  %v547_v4 = vpop.xlane.xlu0 %546 }
 0x105   : > { %3276 = vrsqrt.f32 %v563_v62  ;;  %p3368_p3 = pnand %p3367_p2, %p3361_p13 }
 0x106   : > { %3278 = vrsqrt.f32 %v564_v7 }
 0x107   : > { %1366 = vadd.xlane.f32.xlu1 %v1365_v3  ;;  %3280 = vrsqrt.f32 %v565_v13  ;;  %v3422_v13 = vmov 0.0|0.0  }
 0x108   : > { %1369 = vadd.xlane.f32.xlu0 %v1368_v10  ;;  %v551_v27 = vpop.xlane.xlu0 %550  ;;  %3006 = vmatprep.subr.bf16.mxu1 %v3422_v13 }
 0x109   : > { %v568_v57 = vmax.f32 %v551_v27, 1.0  ;;  %3030 = vmatprep.subr.bf16.mxu0 %v3422_v13  ;;  %v3854_v27 = vld [vmem:[%s3584_s22 + $0xb8] sm:$0xff] }
 0x10b   : > { %1372 = vadd.xlane.f32.xlu1 %v1371_v8  ;;  %v549_v8 = vpop.xlane.xlu1 %548 }
 0x10c   : > { %1375 = vadd.xlane.f32.xlu0 %v1374_v16  ;;  %v3269_v16 = vpop.eup %3268  ;;  %v567_v25 = vmax.f32 %v549_v8, 1.0 }
 0x10d   : > { %v3271_v30 = vpop.eup %3270 }
 0x10e   : > { %v3273_v49 = vpop.eup %3272 }
 0x10f   : > { %1378 = vadd.xlane.f32.xlu1 %v1377_v15  ;;  %v553_v32 = vpop.xlane.xlu1 %552  ;;  %v3275_v34 = vpop.eup %3274 }
 0x110   : > { %1381 = vadd.xlane.f32.xlu0 %v1380_v24  ;;  %v569_v33 = vmax.f32 %v553_v32, 1.0  ;;  %v3277_v37 = vpop.eup %3276  ;;  %v3867_v32 = vld [vmem:[%s3584_s22 + $0xd0] sm:$0xff] }
 0x111   : > { %v3279_v41 = vpop.eup %3278 }
 0x113   : > { %1384 = vadd.xlane.f32.xlu1 %v1383_v23  ;;  %v566_v23 = vmax.f32 %v547_v4, 1.0 }
 0x115   : > { %3282 = vrsqrt.f32 %v566_v23  ;;  %v3843_v23 = vld [vmem:[%s3584_s22 + $0xa0] sm:$0xff] }
 0x116   : > { %3284 = vrsqrt.f32 %v567_v25  ;;  %v3851_v25 = vld [vmem:[%s3584_s22 + $0xb0] sm:$0xff] }
 0x117   : > { %3286 = vrsqrt.f32 %v568_v57  ;;  %v3883_v57 = vld [vmem:[%s3584_s22 + $0xf0] sm:$0xff] }
 0x118   : > { %3288 = vrsqrt.f32 %v569_v33 }
 0x179   : > { %v1343_v33 = vpop.xlane.xlu1 %1342 }
 0x1b5   : > { %v2622_v46 = vpop.f32.mrb[0].mxu0 }
 0x1b6   : > { %v749_v47 = vpop.f32.mrb[1].mxu0  ;;  %v829_v1 = vmul.f32 %v3261_v45, %v2622_v46 }
 0x1b7   : > { %v828_v61 = vmul.f32 %v3259_v43, %v749_v47  ;;  %v3281_v43 = vpop.eup %3280 }
 0x1b8   : > { %v3283_v47 = vpop.eup %3282 }
 0x1b9   : > { %v2625_v3 = vpop.f32.mrb[2].mxu0  ;;  %2660 = vmatprep.mubr.msk.f32.mxu1 %vm850_vm1, %v828_v61  ;;  %v3285_v61 = vpop.eup %3284 }
 0x1ba   : > { %v759_v5 = vpop.f32.mrb[3].mxu0  ;;  %2661 = vmatmul.mubr.msk.f32.vlgmr.msra.gmra.mrb[0].mxu1 %vm850_vm1, %v829_v1  ;;  %v831_v15 = vmul.f32 %v3265_v2, %v2625_v3  ;;  %v3287_v2 = vpop.eup %3286 }
 0x1bb   : > { %v830_v10 = vmul.f32 %v3263_v0, %v759_v5  ;;  %v3289_v4 = vpop.eup %3288 }
 0x1bd   : > { %v2628_v19 = vpop.f32.mrb[4].mxu0  ;;  %2663 = vmatprep.mubr.msk.f32.mxu1 %vm850_vm1, %v830_v10 }
 0x1be   : > { %v769_v22 = vpop.f32.mrb[5].mxu0  ;;  %2664 = vmatmul.mubr.msk.f32.gmra.mrb[2].mxu1 %vm850_vm1, %v831_v15  ;;  %v833_v31 = vmul.f32 %v3269_v16, %v2628_v19  ;;  %v3827_v15 = vld [vmem:[%s3584_s22 + $0x80] sm:$0xff]  ;;  %v3830_v16 = vld [vmem:[%s3584_s22 + $0x88] sm:$0xff]  ;;  %v3835_v19 = vld [vmem:[%s3584_s22 + $0x90] sm:$0xff] }
 0x1bf   : > { %v832_v24 = vmul.f32 %v3267_v14, %v769_v22  ;;  %v3424_v14 = vmov 0.0   ;;  %1276 = vadd.xlane.f32.xlu1 %v3830_v16  ;;  %1274 = vadd.xlane.f32.xlu0 %v3827_v15  ;;  %v3838_v22 = vld [vmem:[%s3584_s22 + $0x98] sm:$0xff] }
 0x1c0   : > { %2751 = vmatprep.mubr.msk.f32.mxu0 %vm3423_vm2, %v3424_v14 }
 0x1c1   : > { %v2631_v52 = vpop.f32.mrb[6].mxu0  ;;  %2666 = vmatprep.mubr.msk.f32.mxu1 %vm850_vm1, %v832_v24  ;;  %v3846_v24 = vld [vmem:[%s3584_s22 + $0xa8] sm:$0xff] }
 0x1c2   : > { %v779_v55 = vpop.f32.mrb[7].mxu0  ;;  %2667 = vmatmul.mubr.msk.f32.gmra.mrb[4].mxu1 %vm850_vm1, %v833_v31  ;;  %v835_v36 = vmul.f32 %v3273_v49, %v2631_v52  ;;  %v3862_v31 = vld [vmem:[%s3584_s22 + $0xc8] sm:$0xff]  ;;  %v3870_v49 = vld [vmem:[%s3584_s22 + $0xd8] sm:$0xff]  ;;  %v3875_v52 = vld [vmem:[%s3584_s22 + $0xe0] sm:$0xff] }
 0x1c3   : > { %v834_v58 = vmul.f32 %v3271_v30, %v779_v55  ;;  %1280 = vadd.xlane.f32.xlu1 %v3838_v22  ;;  %1278 = vadd.xlane.f32.xlu0 %v3835_v19  ;;  %v3859_v30 = vld [vmem:[%s3584_s22 + $0xc0] sm:$0xff]  ;;  %v3878_v55 = vld [vmem:[%s3584_s22 + $0xe8] sm:$0xff] }
 0x1c5   : > { %v2634_v38 = vpop.f32.mrb[8].mxu0  ;;  %2669 = vmatprep.mubr.msk.f32.mxu1 %vm850_vm1, %v834_v58  ;;  %v3886_v58 = vld [vmem:[%s3584_s22 + $0xf8] sm:$0xff] }
 0x1c6   : > { %v789_v39 = vpop.f32.mrb[9].mxu0  ;;  %2670 = vmatmul.mubr.msk.f32.gmra.mrb[6].mxu1 %vm850_vm1, %v835_v36  ;;  %v837_v42 = vmul.f32 %v3277_v37, %v2634_v38  ;;  %v3893_v36 = vld [vmem:[%s4260_s6] ss:$0 sm:$0xff]  ;;  %v3895_v38 = vpop.xlane.xlu1 %1348 }
 0x1c7   : > { %v836_v40 = vmul.f32 %v3275_v34, %v789_v39  ;;  %1284 = vadd.xlane.f32.xlu1 %v3846_v24  ;;  %1282 = vadd.xlane.f32.xlu0 %v3843_v23  ;;  %v1340_v34 = vpop.xlane.xlu0 %1339 }
 0x1c9   : > { %v2637_v44 = vpop.f32.mrb[10].mxu0  ;;  %2672 = vmatprep.mubr.msk.f32.mxu1 %vm850_vm1, %v836_v40 }
 0x1ca   : > { %v799_v45 = vpop.f32.mrb[11].mxu0  ;;  %2673 = vmatmul.mubr.msk.f32.gmra.mrb[8].mxu1 %vm850_vm1, %v837_v42  ;;  %v839_v60 = vmul.f32 %v3281_v43, %v2637_v44 }
 0x1cb   : > { %v838_v46 = vmul.f32 %v3279_v41, %v799_v45  ;;  %1288 = vadd.xlane.f32.xlu1 %v3854_v27  ;;  %1286 = vadd.xlane.f32.xlu0 %v3851_v25  ;;  %v3898_v41 = vpop.xlane.xlu0 %1345 }
 0x1cd   : > { %v2640_v62 = vpop.f32.mrb[12].mxu0  ;;  %2675 = vmatprep.mubr.msk.f32.mxu1 %vm850_vm1, %v838_v46 }
 0x1ce   : > { %v809_v0 = vpop.f32.mrb[13].mxu0  ;;  %2676 = vmatmul.mubr.msk.f32.gmra.mrb[10].mxu1 %vm850_vm1, %v839_v60  ;;  %v841_v3 = vmul.f32 %v3285_v61, %v2640_v62 }
 0x1cf   : > { %v840_v1 = vmul.f32 %v3283_v47, %v809_v0  ;;  %1292 = vadd.xlane.f32.xlu1 %v3862_v31  ;;  %1290 = vadd.xlane.f32.xlu0 %v3859_v30 }
 0x1d1   : > { %v2643_v5 = vpop.f32.mrb[14].mxu0  ;;  %2678 = vmatprep.mubr.msk.f32.mxu1 %vm850_vm1, %v840_v1  ;;  %v3905_v1 = vpop.xlane.xlu1 %1354 }
 0x1d2   : > { %v819_v7 = vpop.f32.mrb[15].mxu0  ;;  %2679 = vmatmul.mubr.msk.f32.gmra.mrb[12].mxu1 %vm850_vm1, %v841_v3  ;;  %v843_v10 = vmul.f32 %v3289_v4, %v2643_v5  ;;  %v3907_v3 = vpop.xlane.xlu0 %1351 }
 0x1d3   : > { %v842_v8 = vmul.f32 %v3287_v2, %v819_v7  ;;  %1296 = vadd.xlane.f32.xlu1 %v3870_v49  ;;  %1294 = vadd.xlane.f32.xlu0 %v3867_v32 }
 0x1d5   : > { %2681 = vmatprep.mubr.msk.f32.mxu1 %vm850_vm1, %v842_v8 }
 0x1d6   : > { %2682 = vmatmul.mubr.msk.f32.gmra.mrb[14].mxu1 %vm850_vm1, %v843_v10 }
 0x1d7   : > { %2716 = vmatprep.mubr.msk.f32.mxu1 %vm3423_vm2, %v3424_v14  ;;  %1300 = vadd.xlane.f32.xlu1 %v3878_v55 }
 0x1d8   : > { %1298 = vadd.xlane.f32.xlu0 %v3875_v52 }
 0x1db   : > { %1304 = vadd.xlane.f32.xlu1 %v3886_v58 }
 0x1dc   : > { %1302 = vadd.xlane.f32.xlu0 %v3883_v57 }
 0x28d   : > { %v2662_v37 = vpop.f32.mrb[0].mxu1 }
 0x28e   : > { %v971_v39 = vadd.f32 %v2662_v37, %v3893_v36  ;;  %v965_v40 = vpop.f32.mrb[1].mxu1 }
 0x28f   : > { %v966_v42 = vadd.f32 %v3893_v36, %v965_v40 }
 0x290   : > { %v1045_v43 = vmax.f32 %v971_v39, 0.0 }
 0x291   : > { %v1044_v44 = vmax.f32 %v966_v42, 0.0  ;;  %v2665_v45 = vpop.f32.mrb[2].mxu1  ;;  %v1387_v42 = vmax.f32 %v1343_v33, 1.0 }
 0x292   : > { %v1135_v46 = vmul.f32 %v3693_v20, %v1045_v43  ;;  %v981_v47 = vadd.f32 %v2665_v45, %v3893_v36  ;;  %v975_v60 = vpop.f32.mrb[3].mxu1 }
 0x293   : > { %v3007_v61 = vpack.c.bf16 %v1045_v43, %v1044_v44  ;;  %v1134_v62 = vmul.f32 %v3686_v11, %v1044_v44  ;;  %v976_v0 = vadd.f32 %v3893_v36, %v975_v60  ;;  %3290 = vrsqrt.f32 %v1387_v42 }
 0x294   : > { %v1047_v2 = vmax.f32 %v981_v47, 0.0 }
 0x295   : > { %v3031_v4 = vpack.c.bf16 %v1135_v46, %v1134_v62  ;;  %v1046_v5 = vmax.f32 %v976_v0, 0.0  ;;  %v2668_v7 = vpop.f32.mrb[4].mxu1  ;;  %3008 = vmatpush3.bf16.msra.mxu1 %v3007_v61  ;;  %v3915_v46 = vpop.xlane.xlu1 %1360 }
 0x296   : > { %v1137_v8 = vmul.f32 %v3691_v17, %v1047_v2  ;;  %v991_v20 = vadd.f32 %v2668_v7, %v3893_v36  ;;  %v985_v10 = vpop.f32.mrb[5].mxu1  ;;  %3009 = vmatprep.subr.bf16.mxu1 %v3422_v13  ;;  %v1386_v17 = vmax.f32 %v1340_v34, 1.0  ;;  %v1389_v34 = vmax.f32 %v3895_v38, 1.0 }
 0x297   : > { %v3010_v37 = vpack.c.bf16 %v1047_v2, %v1046_v5  ;;  %v1136_v11 = vmul.f32 %v3683_v9, %v1046_v5  ;;  %v986_v39 = vadd.f32 %v3893_v36, %v985_v10  ;;  %3032 = vmatpush3.bf16.msra.mxu0 %v3031_v4  ;;  %v3920_v9 = vpop.xlane.xlu0 %1357  ;;  %v1388_v7 = vmax.f32 %v3898_v41, 1.0 }
 0x298   : > { %v1049_v40 = vmax.f32 %v991_v20, 0.0  ;;  %3033 = vmatprep.subr.bf16.mxu0 %v3422_v13  ;;  %3292 = vrsqrt.f32 %v1386_v17  ;;  %v1391_v41 = vmax.f32 %v3905_v1, 1.0 }
 0x299   : > { %v3034_v43 = vpack.c.bf16 %v1137_v8, %v1136_v11  ;;  %v1048_v44 = vmax.f32 %v986_v39, 0.0  ;;  %v2671_v45 = vpop.f32.mrb[6].mxu1  ;;  %3011 = vmatpush3.bf16.msra.mxu1 %v3010_v37  ;;  %v3932_v38 = vpop.xlane.xlu1 %1366  ;;  %3294 = vrsqrt.f32 %v1389_v34 }
 0x29a   : > { %v1139_v47 = vmul.f32 %v3701_v29, %v1049_v40  ;;  %v1001_v60 = vadd.f32 %v2671_v45, %v3893_v36  ;;  %v995_v61 = vpop.f32.mrb[7].mxu1  ;;  %3012 = vmatprep.subr.bf16.mxu1 %v3422_v13  ;;  %3296 = vrsqrt.f32 %v1388_v7 }
 0x29b   : > { %v3013_v62 = vpack.c.bf16 %v1049_v40, %v1048_v44  ;;  %v1138_v0 = vmul.f32 %v3703_v48, %v1048_v44  ;;  %v996_v33 = vadd.f32 %v3893_v36, %v995_v61  ;;  %3035 = vmatpush3.bf16.msra.mxu0 %v3034_v43  ;;  %3298 = vrsqrt.f32 %v1391_v41 }
 0x29c   : > { %v1051_v2 = vmax.f32 %v1001_v60, 0.0  ;;  %3036 = vmatprep.subr.bf16.mxu0 %v3422_v13 }
 0x29d   : > { %v3037_v29 = vpack.c.bf16 %v1139_v47, %v1138_v0  ;;  %v1050_v4 = vmax.f32 %v996_v33, 0.0  ;;  %v2674_v5 = vpop.f32.mrb[8].mxu1  ;;  %3014 = vmatpush3.bf16.msra.mxu1 %v3013_v62  ;;  %v1393_v62 = vmax.f32 %v3915_v46, 1.0  ;;  %v1392_v33 = vmax.f32 %v3920_v9, 1.0  ;;  %v2341_v9 = vld [vmem:[%s3681_s19 + $0x80] sm:$0xff] }
 0x29e   : > { %v1141_v8 = vmul.f32 %v3709_v59, %v1051_v2  ;;  %v1011_v48 = vadd.f32 %v2674_v5, %v3893_v36  ;;  %v1005_v20 = vpop.f32.mrb[9].mxu1  ;;  %3015 = vmatprep.subr.bf16.mxu1 %v3422_v13  ;;  %v3936_v59 = vpop.xlane.xlu0 %1363 }
 0x29f   : > { %v3016_v10 = vpack.c.bf16 %v1051_v2, %v1050_v4  ;;  %v1140_v37 = vmul.f32 %v3711_v63, %v1050_v4  ;;  %v1006_v11 = vadd.f32 %v3893_v36, %v1005_v20  ;;  %3038 = vmatpush3.bf16.msra.mxu0 %v3037_v29  ;;  %v1390_v63 = vmax.f32 %v3907_v3, 1.0  ;;  %v1373_v2 = vpop.xlane.xlu1 %1372  ;;  %v2342_v20 = vld [vmem:[%s3681_s19 + $0x88] sm:$0xff] }
 0x2a0   : > { %v1053_v39 = vmax.f32 %v1011_v48, 0.0  ;;  %3039 = vmatprep.subr.bf16.mxu0 %v3422_v13 }
 0x2a1   : > { %v3040_v40 = vpack.c.bf16 %v1141_v8, %v1140_v37  ;;  %v1052_v42 = vmax.f32 %v1006_v11, 0.0  ;;  %v2677_v43 = vpop.f32.mrb[10].mxu1  ;;  %3017 = vmatpush3.bf16.msra.mxu1 %v3016_v10  ;;  %3300 = vrsqrt.f32 %v1390_v63 }
 0x2a2   : > { %v1143_v44 = vmul.f32 %v3717_v6, %v1053_v39  ;;  %v1021_v45 = vadd.f32 %v2677_v43, %v3893_v36  ;;  %v1015_v17 = vpop.f32.mrb[11].mxu1  ;;  %3018 = vmatprep.subr.bf16.mxu1 %v3422_v13  ;;  %v1370_v46 = vpop.xlane.xlu0 %1369  ;;  %3302 = vrsqrt.f32 %v1393_v62 }
 0x2a3   : > { %v3019_v47 = vpack.c.bf16 %v1053_v39, %v1052_v42  ;;  %v1142_v60 = vmul.f32 %v3719_v12, %v1052_v42  ;;  %v1016_v1 = vadd.f32 %v3893_v36, %v1015_v17  ;;  %3041 = vmatpush3.bf16.msra.mxu0 %v3040_v40  ;;  %v3947_v12 = vpop.eup %3290  ;;  %3304 = vrsqrt.f32 %v1392_v33 }
 0x2a4   : > { %v1055_v61 = vmax.f32 %v1021_v45, 0.0  ;;  %3042 = vmatprep.subr.bf16.mxu0 %v3422_v13  ;;  %v3952_v5 = vpop.eup %3292  ;;  %v1419_v63 = vmul.f32 %v3947_v12, %v2342_v20  ;;  %v3990_v20 = vld [vmem:[%s4258_s4] sm:$0xff] }
 0x2a5   : > { %v3043_v3 = vpack.c.bf16 %v1143_v44, %v1142_v60  ;;  %v1054_v0 = vmax.f32 %v1016_v1, 0.0  ;;  %v2680_v6 = vpop.f32.mrb[12].mxu1  ;;  %3020 = vmatpush3.bf16.msra.mxu1 %v3019_v47  ;;  %v3961_v41 = vpop.eup %3294  ;;  %v2343_v47 = vld [vmem:[%s3681_s19 + $0x90] sm:$0xff]  ;;  %v2344_v60 = vld [vmem:[%s3681_s19 + $0x98] sm:$0xff] }
 0x2a6   : > { %v1145_v34 = vmul.f32 %v3725_v18, %v1055_v61  ;;  %v1031_v29 = vadd.f32 %v2680_v6, %v3893_v36  ;;  %v1025_v4 = vpop.f32.mrb[13].mxu1  ;;  %3021 = vmatprep.subr.bf16.mxu1 %v3422_v13  ;;  %v1395_v18 = vmax.f32 %v3932_v38, 1.0  ;;  %v1418_v38 = vmul.f32 %v3952_v5, %v2341_v9  ;;  %v3968_v44 = vpop.eup %3296  ;;  %v2346_v9 = vld [vmem:[%s3681_s19 + $0xa8] sm:$0xff] }
 0x2a7   : > { %v3022_v7 = vpack.c.bf16 %v1055_v61, %v1054_v0  ;;  %v1144_v8 = vmul.f32 %v3727_v21, %v1054_v0  ;;  %v1026_v48 = vadd.f32 %v3893_v36, %v1025_v4  ;;  %3044 = vmatpush3.bf16.msra.mxu0 %v3043_v3  ;;  %v1394_v21 = vmax.f32 %v3936_v59, 1.0  ;;  %v1376_v62 = vpop.xlane.xlu0 %1375 }
 0x2a8   : > { %v1057_v10 = vmax.f32 %v1031_v29, 0.0  ;;  %3045 = vmatprep.subr.bf16.mxu0 %v3422_v13  ;;  %3306 = vrsqrt.f32 %v1395_v18  ;;  %v1397_v61 = vmax.f32 %v1373_v2, 1.0  ;;  %v1396_v6 = vmax.f32 %v1370_v46, 1.0 }
 0x2a9   : > { %v3046_v37 = vpack.c.bf16 %v1145_v34, %v1144_v8  ;;  %v1056_v11 = vmax.f32 %v1026_v48, 0.0  ;;  %v2683_v39 = vpop.f32.mrb[14].mxu1  ;;  %3023 = vmatpush3.bf16.msra.mxu1 %v3022_v7  ;;  %3308 = vrsqrt.f32 %v1394_v21  ;;  %v3054_v34 = vpack.c.bf16 %v1419_v63, %v1418_v38  ;;  %v2345_v48 = vld [vmem:[%s3681_s19 + $0xa0] sm:$0xff] }
 0x2aa   : > { %v1147_v40 = vmul.f32 %v3733_v26, %v1057_v10  ;;  %v1041_v42 = vadd.f32 %v2683_v39, %v3893_v36  ;;  %v1035_v43 = vpop.f32.mrb[15].mxu1  ;;  %3024 = vmatprep.subr.bf16.mxu1 %v3422_v13  ;;  %v1379_v26 = vpop.xlane.xlu1 %1378  ;;  %v1420_v29 = vmul.f32 %v3968_v44, %v2343_v47  ;;  %v1421_v4 = vmul.f32 %v3961_v41, %v2344_v60 }
 0x2ab   : > { %v3025_v45 = vpack.c.bf16 %v1057_v10, %v1056_v11  ;;  %v1146_v17 = vmul.f32 %v3735_v28, %v1056_v11  ;;  %v1036_v59 = vadd.f32 %v3893_v36, %v1035_v43  ;;  %3047 = vmatpush3.bf16.msra.mxu0 %v3046_v37  ;;  %v3975_v28 = vpop.eup %3298  ;;  %3310 = vrsqrt.f32 %v1397_v61  ;;  %v1382_v21 = vpop.xlane.xlu0 %1381  ;;  %v2348_v43 = vld [vmem:[%s3681_s19 + $0xb8] sm:$0xff] }
 0x2ac   : > { %v1059_v1 = vmax.f32 %v1041_v42, 0.0  ;;  %3048 = vmatprep.subr.bf16.mxu0 %v3422_v13  ;;  %v3981_v2 = vpop.eup %3300  ;;  %3312 = vrsqrt.f32 %v1396_v6  ;;  %v1398_v10 = vmax.f32 %v1376_v62, 1.0  ;;  %v3058_v37 = vpack.c.bf16 %v1421_v4, %v1420_v29  ;;  %v2347_v42 = vld [vmem:[%s3681_s19 + $0xb0] sm:$0xff] }
 0x2ad   : > { %v3049_v3 = vpack.c.bf16 %v1147_v40, %v1146_v17  ;;  %v1058_v0 = vmax.f32 %v1036_v59, 0.0  ;;  %3026 = vmatpush3.bf16.msra.mxu1 %v3025_v45  ;;  %v1422_v11 = vmul.f32 %v3981_v2, %v2345_v48  ;;  %v1423_v39 = vmul.f32 %v3975_v28, %v2346_v9  ;;  %v2351_v6 = vld [vmem:[%s3681_s19 + $0xd0] sm:$0xff]  ;;  %v2353_v48 = vld [vmem:[%s3681_s19 + $0xe0] sm:$0xff]  ;;  %v2354_v9 = vld [vmem:[%s3681_s19 + $0xe8] sm:$0xff] }
 0x2ae   : > { %v1149_v33 = vmul.f32 %v3741_v50, %v1059_v1  ;;  %3027 = vmatprep.subr.bf16.mxu1 %v3422_v13  ;;  %v1399_v50 = vmax.f32 %v1379_v26, 1.0  ;;  %v1385_v18 = vpop.xlane.xlu1 %1384  ;;  %v1400_v63 = vmax.f32 %v1382_v21, 1.0  ;;  %v2349_v26 = vld [vmem:[%s3681_s19 + $0xc0] sm:$0xff] }
 0x2af   : > { %v3028_v7 = vpack.c.bf16 %v1059_v1, %v1058_v0  ;;  %v1148_v8 = vmul.f32 %v3743_v54, %v1058_v0  ;;  %3050 = vmatpush3.bf16.msra.mxu0 %v3049_v3  ;;  %v3992_v54 = vpop.eup %3302  ;;  %v1401_v38 = vmax.f32 %v1385_v18, 1.0  ;;  %v3062_v17 = vpack.c.bf16 %v1423_v39, %v1422_v11  ;;  %v2350_v1 = vld [vmem:[%s3681_s19 + $0xc8] sm:$0xff]  ;;  %v2355_v11 = vld [vmem:[%s3681_s19 + $0xf0] sm:$0xff]  ;;  %v2356_v39 = vld [vmem:[%s3681_s19 + $0xf8] sm:$0xff] }
 0x2b0   : > { %3051 = vmatprep.subr.bf16.mxu0 %v3422_v13  ;;  %v3996_v40 = vpop.eup %3304  ;;  %3314 = vrsqrt.f32 %v1399_v50  ;;  %v1425_v47 = vmul.f32 %v3992_v54, %v2348_v43 }
 0x2b1   : > { %v3052_v46 = vpack.c.bf16 %v1149_v33, %v1148_v8  ;;  %3029 = vmatpush3.bf16.msra.mxu1 %v3028_v7  ;;  %3316 = vrsqrt.f32 %v1398_v10  ;;  %v1424_v59 = vmul.f32 %v3996_v40, %v2347_v42  ;;  %v2352_v33 = vld [vmem:[%s3681_s19 + $0xd8] sm:$0xff]  ;;  %s4211_s19 = scalar_lea.hbm %s4265_s11, %s2387_s0 }
 0x2b2   : > { %3055 = vmatprep.subr.bf16.mxu1 %v3054_v34  ;;  %v4003_v45 = vpop.eup %3306  ;;  %3318 = vrsqrt.f32 %v1401_v38 }
 0x2b3   : > { %3053 = vmatpush3.bf16.msra.mxu0 %v3052_v46  ;;  %v4007_v60 = vpop.eup %3308  ;;  %3320 = vrsqrt.f32 %v1400_v63  ;;  %v1427_v3 = vmul.f32 %v4003_v45, %v2350_v1 }
 0x2b4   : > { %2717 = vmatmul.mubr.f32.vlgmr.msra.gmra.mrb[16].mxu1 %v3990_v20  ;;  %3087 = vmatprep.subr.bf16.mxu0 %v3656_v51  ;;  %v1426_v62 = vmul.f32 %v4007_v60, %v2349_v26 }
 0x2b5   : > { %3057 = vmatpush3.bf16.msra.mxu1 %v3054_v34  ;;  %2786 = vmatprep.mubr.f32.mxu1 %v3827_v15  ;;  %v4011_v61 = vpop.eup %3310  ;;  %v3066_v15 = vpack.c.bf16 %v1425_v47, %v1424_v59 }
 0x2b6   : > { %3059 = vmatprep.subr.bf16.mxu1 %v3058_v37  ;;  %v4015_v0 = vpop.eup %3312  ;;  %v3070_v29 = vpack.c.bf16 %v1427_v3, %v1426_v62  ;;  %v1429_v7 = vmul.f32 %v4011_v61, %v2352_v33 }
 0x2b7   : > { %v1428_v4 = vmul.f32 %v4015_v0, %v2351_v6 }
 0x2b9   : > { %3061 = vmatpush3.bf16.msra.mxu1 %v3058_v37  ;;  %v3074_v46 = vpack.c.bf16 %v1429_v7, %v1428_v4 }
 0x2ba   : > { %3063 = vmatprep.subr.bf16.mxu1 %v3062_v17  ;;  %v4019_v34 = vpop.eup %3314 }
 0x2bb   : > { %v4023_v8 = vpop.eup %3316  ;;  %v1431_v18 = vmul.f32 %v4019_v34, %v2354_v9 }
 0x2bc   : > { %v4027_v50 = vpop.eup %3318  ;;  %v1430_v10 = vmul.f32 %v4023_v8, %v2353_v48 }
 0x2bd   : > { %3065 = vmatpush3.bf16.msra.mxu1 %v3062_v17  ;;  %v4031_v37 = vpop.eup %3320  ;;  %v1433_v43 = vmul.f32 %v4027_v50, %v2356_v39 }
 0x2be   : > { %3067 = vmatprep.subr.bf16.mxu1 %v3066_v15  ;;  %v3078_v21 = vpack.c.bf16 %v1431_v18, %v1430_v10  ;;  %v1432_v42 = vmul.f32 %v4031_v37, %v2355_v11 }
 0x2c0   : > { %v3082_v38 = vpack.c.bf16 %v1433_v43, %v1432_v42 }
 0x2c1   : > { %3069 = vmatpush3.bf16.msra.mxu1 %v3066_v15 }
 0x2c2   : > { %3071 = vmatprep.subr.bf16.mxu1 %v3070_v29 }
 0x2c5   : > { %3073 = vmatpush3.bf16.msra.mxu1 %v3070_v29 }
 0x2c6   : > { %3075 = vmatprep.subr.bf16.mxu1 %v3074_v46 }
 0x2c9   : > { %3077 = vmatpush3.bf16.msra.mxu1 %v3074_v46 }
 0x2ca   : > { %3079 = vmatprep.subr.bf16.mxu1 %v3078_v21 }
 0x2cd   : > { %3081 = vmatpush3.bf16.msra.mxu1 %v3078_v21 }
 0x2ce   : > { %3083 = vmatprep.subr.bf16.mxu1 %v3082_v38 }
 0x2d1   : > { %3085 = vmatpush3.bf16.msra.mxu1 %v3082_v38 }
 0x2d2   : > { %3126 = vmatprep.subr.bf16.mxu1 %v3422_v13 }
 0x2d4   : > { %2787 = vmatmul.mubr.f32.vlgmr.msra.gmra.mrb[18].mxu1 %v3830_v16  ;;  %v505_v16 = vld [vmem:[%s4059_s1] sm:$0xff] }
 0x2d5   : > { %2789 = vmatprep.mubr.f32.mxu1 %v3835_v19  ;;  %2752 = vmatmul.mubr.f32.vlgmr.msra.gmra.mrb[16].mxu0 %v505_v16 }
 0x2d6   : > { %1130 = vadd.xlane.f32.xlu0 %v505_v16  ;;  %3089 = vmatpush3.bf16.msra.mxu0 %v3656_v51 }
 0x2d7   : > { %3091 = vmatprep.subr.bf16.mxu0 %v3661_v53 }
 0x2d8   : > { %2790 = vmatmul.mubr.f32.gmra.mrb[20].mxu1 %v3838_v22  ;;  %v1275_v22 = vpop.xlane.xlu0 %1274 }
 0x2d9   : > { %2792 = vmatprep.mubr.f32.mxu1 %v3843_v23 }
 0x2da   : > { %3093 = vmatpush3.bf16.msra.mxu0 %v3661_v53  ;;  %v1306_v53 = vmax.f32 %v1275_v22, 1.0 }
 0x2db   : > { %3095 = vmatprep.subr.bf16.mxu0 %v3672_v56 }
 0x2dc   : > { %2793 = vmatmul.mubr.f32.gmra.mrb[22].mxu1 %v3846_v24  ;;  %v1277_v24 = vpop.xlane.xlu1 %1276  ;;  %v1279_v51 = vpop.xlane.xlu0 %1278  ;;  %3322 = vrsqrt.f32 %v1306_v53 }
 0x2dd   : > { %2795 = vmatprep.mubr.f32.mxu1 %v3851_v25 }
 0x2de   : > { %3097 = vmatpush3.bf16.msra.mxu0 %v3672_v56  ;;  %v1308_v56 = vmax.f32 %v1279_v51, 1.0 }
 0x2df   : > { %3099 = vmatprep.subr.bf16.mxu0 %v3768_v35 }
 0x2e0   : > { %2796 = vmatmul.mubr.f32.gmra.mrb[24].mxu1 %v3854_v27  ;;  %v1281_v25 = vpop.xlane.xlu1 %1280  ;;  %v1283_v27 = vpop.xlane.xlu0 %1282 }
 0x2e1   : > { %2798 = vmatprep.mubr.f32.mxu1 %v3859_v30 }
 0x2e2   : > { %3101 = vmatpush3.bf16.msra.mxu0 %v3768_v35 }
 0x2e3   : > { %3102 = vmatprep.subr.bf16.mxu0 %v3422_v13 }
 0x2e4   : > { %2799 = vmatmul.mubr.f32.gmra.mrb[26].mxu1 %v3862_v31  ;;  %v1285_v30 = vpop.xlane.xlu1 %1284  ;;  %v1307_v31 = vmax.f32 %v1277_v24, 1.0 }
 0x2e5   : > { %2801 = vmatprep.mubr.f32.mxu1 %v3867_v32  ;;  %v1287_v32 = vpop.xlane.xlu0 %1286 }
 0x2e6   : > { %3324 = vrsqrt.f32 %v1307_v31  ;;  %v1312_v63 = vmax.f32 %v1287_v32, 1.0  ;;  %v3323_v47 = vpop.eup %3322 }
 0x2e7   : > { %3326 = vrsqrt.f32 %v1308_v56 }
 0x2e8   : > { %2802 = vmatmul.mubr.f32.gmra.mrb[28].mxu1 %v3870_v49  ;;  %v1289_v49 = vpop.xlane.xlu1 %1288 }
 0x2e9   : > { %2804 = vmatprep.mubr.f32.mxu1 %v3875_v52  ;;  %v1309_v52 = vmax.f32 %v1281_v25, 1.0  ;;  %v1291_v35 = vpop.xlane.xlu0 %1290  ;;  %v1313_v17 = vmax.f32 %v1289_v49, 1.0 }
 0x2ea   : > { %v1314_v3 = vmax.f32 %v1291_v35, 1.0 }
 0x2eb   : > { %3328 = vrsqrt.f32 %v1309_v52 }
 0x2ec   : > { %2805 = vmatmul.mubr.f32.gmra.mrb[30].mxu1 %v3878_v55  ;;  %v1310_v55 = vmax.f32 %v1283_v27, 1.0 }
 0x2ed   : > { %2807 = vmatprep.mubr.f32.mxu1 %v3883_v57  ;;  %v1293_v57 = vpop.xlane.xlu1 %1292  ;;  %v1295_v59 = vpop.xlane.xlu0 %1294 }
 0x2ee   : > { %3330 = vrsqrt.f32 %v1310_v55  ;;  %v1315_v33 = vmax.f32 %v1293_v57, 1.0  ;;  %v1316_v10 = vmax.f32 %v1295_v59, 1.0 }
 0x2f0   : > { %2808 = vmatmul.mubr.f32.gmra.mrb[32].mxu1 %v3886_v58  ;;  %v1311_v58 = vmax.f32 %v1285_v30, 1.0  ;;  %v3325_v1 = vpop.eup %3324 }
 0x2f1   : > { %2917 = vmatprep.mubr.msk.f32.mxu1 %vm3423_vm2, %v3424_v14  ;;  %v1297_v26 = vpop.xlane.xlu1 %1296  ;;  %v3327_v29 = vpop.eup %3326 }
 0x2f2   : > { %3332 = vrsqrt.f32 %v1311_v58  ;;  %v1299_v9 = vpop.xlane.xlu0 %1298  ;;  %v1317_v39 = vmax.f32 %v1297_v26, 1.0 }
 0x2f3   : > { %3334 = vrsqrt.f32 %v1312_v63  ;;  %v1318_v22 = vmax.f32 %v1299_v9, 1.0 }
 0x2f4   : > { %3336 = vrsqrt.f32 %v1313_v17 }
 0x2f5   : > { %v3329_v7 = vpop.eup %3328  ;;  %3338 = vrsqrt.f32 %v1314_v3  ;;  %v1301_v18 = vpop.xlane.xlu1 %1300 }
 0x2f6   : > { %3340 = vrsqrt.f32 %v1315_v33  ;;  %v1319_v24 = vmax.f32 %v1301_v18, 1.0  ;;  %v1303_v51 = vpop.xlane.xlu0 %1302 }
 0x2f7   : > { %3342 = vrsqrt.f32 %v1316_v10  ;;  %v1320_v49 = vmax.f32 %v1303_v51, 1.0 }
 0x2f8   : > { %v3331_v21 = vpop.eup %3330  ;;  %3344 = vrsqrt.f32 %v1317_v39 }
 0x2f9   : > { %v1305_v30 = vpop.xlane.xlu1 %1304  ;;  %3346 = vrsqrt.f32 %v1318_v22 }
 0x2fa   : > { %3348 = vrsqrt.f32 %v1319_v24  ;;  %v1321_v52 = vmax.f32 %v1305_v30, 1.0 }
 0x2fb   : > { %3350 = vrsqrt.f32 %v1320_v49 }
 0x2fc   : > { %v3333_v43 = vpop.eup %3332  ;;  %3352 = vrsqrt.f32 %v1321_v52 }
 0x2fd   : > { %v3335_v25 = vpop.eup %3334 }
 0x2fe   : > { %v3337_v53 = vpop.eup %3336 }
 0x2ff   : > { %v3339_v35 = vpop.eup %3338 }
 0x300   : > { %v3341_v57 = vpop.eup %3340 }
 0x301   : > { %v3343_v59 = vpop.eup %3342 }
 0x302   : > { %v3345_v26 = vpop.eup %3344 }
 0x303   : > { %v3347_v3 = vpop.eup %3346 }
 0x304   : > { %v3349_v33 = vpop.eup %3348 }
 0x387   : > { %v4070_v19 = vpop.f32.mrb[16].mxu1 }
 0x388   : > { %v2718_v23 = vpop.f32.mrb[17].mxu1 }
 0x3a7   : > { %v2788_v15 = vpop.f32.mrb[18].mxu1 }
 0x3a8   : > { %v1500_v62 = vpop.f32.mrb[19].mxu1  ;;  %v1580_v4 = vmul.f32 %v3325_v1, %v2788_v15 }
 0x3a9   : > { %v1579_v6 = vmul.f32 %v3323_v47, %v1500_v62 }
 0x3ab   : > { %v2791_v48 = vpop.f32.mrb[20].mxu1  ;;  %2826 = vmatprep.mubr.msk.f32.mxu0 %vm850_vm1, %v1579_v6 }
 0x3ac   : > { %v1510_v46 = vpop.f32.mrb[21].mxu1  ;;  %2827 = vmatmul.mubr.msk.f32.vlgmr.msra.gmra.mrb[18].mxu0 %vm850_vm1, %v1580_v4  ;;  %v1582_v42 = vmul.f32 %v3329_v7, %v2791_v48  ;;  %v3351_v48 = vpop.eup %3350 }
 0x3ad   : > { %v1581_v11 = vmul.f32 %v3327_v29, %v1510_v46  ;;  %v3353_v46 = vpop.eup %3352 }
 0x3af   : > { %v2794_v38 = vpop.f32.mrb[22].mxu1  ;;  %2829 = vmatprep.mubr.msk.f32.mxu0 %vm850_vm1, %v1581_v11 }
 0x3b0   : > { %v1520_v16 = vpop.f32.mrb[23].mxu1  ;;  %2830 = vmatmul.mubr.msk.f32.gmra.mrb[20].mxu0 %vm850_vm1, %v1582_v42  ;;  %v1584_v27 = vmul.f32 %v3333_v43, %v2794_v38  ;;  %v4093_v43 = vld [vmem:[%s4059_s1 + $0x8] sm:$0xff] }
 0x3b1   : > { %v1583_v23 = vmul.f32 %v3331_v21, %v1520_v16  ;;  %v4090_v21 = vpop.f32.mrb[16].mxu0  ;;  %1874 = vadd.xlane.f32.xlu1 %v4093_v43 }
 0x3b2   : > { %v2753_v42 = vpop.f32.mrb[17].mxu0 }
 0x3b3   : > { %v2797_v31 = vpop.f32.mrb[24].mxu1  ;;  %2832 = vmatprep.mubr.msk.f32.mxu0 %vm850_vm1, %v1583_v23 }
 0x3b4   : > { %v1530_v32 = vpop.f32.mrb[25].mxu1  ;;  %2833 = vmatmul.mubr.msk.f32.gmra.mrb[22].mxu0 %vm850_vm1, %v1584_v27  ;;  %v1586_v55 = vmul.f32 %v3337_v53, %v2797_v31 }
 0x3b5   : > { %v1585_v56 = vmul.f32 %v3335_v25, %v1530_v32 }
 0x3b7   : > { %v2800_v58 = vpop.f32.mrb[26].mxu1  ;;  %2835 = vmatprep.mubr.msk.f32.mxu0 %vm850_vm1, %v1585_v56 }
 0x3b8   : > { %v1540_v63 = vpop.f32.mrb[27].mxu1  ;;  %2836 = vmatmul.mubr.msk.f32.gmra.mrb[24].mxu0 %vm850_vm1, %v1586_v55  ;;  %v1588_v47 = vmul.f32 %v3341_v57, %v2800_v58 }
 0x3b9   : > { %v1587_v17 = vmul.f32 %v3339_v35, %v1540_v63 }
 0x3bb   : > { %v2803_v1 = vpop.f32.mrb[28].mxu1  ;;  %2838 = vmatprep.mubr.msk.f32.mxu0 %vm850_vm1, %v1587_v17 }
 0x3bc   : > { %v1550_v15 = vpop.f32.mrb[29].mxu1  ;;  %2839 = vmatmul.mubr.msk.f32.gmra.mrb[26].mxu0 %vm850_vm1, %v1588_v47  ;;  %v1590_v6 = vmul.f32 %v3345_v26, %v2803_v1 }
 0x3bd   : > { %v1589_v62 = vmul.f32 %v3343_v59, %v1550_v15 }
 0x3bf   : > { %v2806_v29 = vpop.f32.mrb[30].mxu1  ;;  %2841 = vmatprep.mubr.msk.f32.mxu0 %vm850_vm1, %v1589_v62 }
 0x3c0   : > { %v1560_v4 = vpop.f32.mrb[31].mxu1  ;;  %2842 = vmatmul.mubr.msk.f32.gmra.mrb[28].mxu0 %vm850_vm1, %v1590_v6  ;;  %v1592_v9 = vmul.f32 %v3349_v33, %v2806_v29 }
 0x3c1   : > { %v1591_v7 = vmul.f32 %v3347_v3, %v1560_v4 }
 0x3c3   : > { %v2809_v10 = vpop.f32.mrb[32].mxu1  ;;  %2844 = vmatprep.mubr.msk.f32.mxu0 %vm850_vm1, %v1591_v7 }
 0x3c4   : > { %v1570_v18 = vpop.f32.mrb[33].mxu1  ;;  %2845 = vmatmul.mubr.msk.f32.gmra.mrb[30].mxu0 %vm850_vm1, %v1592_v9  ;;  %v1594_v39 = vmul.f32 %v3353_v46, %v2809_v10  ;;  %v1131_v9 = vpop.xlane.xlu0 %1130 }
 0x3c5   : > { %v1593_v11 = vmul.f32 %v3351_v48, %v1570_v18 }
 0x3c7   : > { %2847 = vmatprep.mubr.msk.f32.mxu0 %vm850_vm1, %v1593_v11 }
 0x3c8   : > { %2848 = vmatmul.mubr.msk.f32.gmra.mrb[32].mxu0 %vm850_vm1, %v1594_v39 }
 0x3c9   : > { %2882 = vmatprep.mubr.msk.f32.mxu0 %vm3423_vm2, %v3424_v14 }
 0x47f   : > { %v2828_v38 = vpop.f32.mrb[18].mxu0 }
 0x480   : > { %v1715_v16 = vadd.f32 %v2828_v38, %v3893_v36  ;;  %v1709_v22 = vpop.f32.mrb[19].mxu0 }
 0x481   : > { %v1710_v23 = vadd.f32 %v3893_v36, %v1709_v22 }
 0x482   : > { %v1789_v24 = vmax.f32 %v1715_v16, 0.0 }
 0x483   : > { %v1788_v51 = vmax.f32 %v1710_v23, 0.0  ;;  %v2831_v25 = vpop.f32.mrb[20].mxu0 }
 0x484   : > { %v1879_v27 = vmul.f32 %v3947_v12, %v1789_v24  ;;  %v1725_v14 = vadd.f32 %v2831_v25, %v3893_v36  ;;  %v1719_v30 = vpop.f32.mrb[21].mxu0 }
 0x485   : > { %v3103_v53 = vpack.c.bf16 %v1789_v24, %v1788_v51  ;;  %v1878_v31 = vmul.f32 %v3952_v5, %v1788_v51  ;;  %v1720_v32 = vadd.f32 %v3893_v36, %v1719_v30 }
 0x486   : > { %v1791_v49 = vmax.f32 %v1725_v14, 0.0 }
 0x487   : > { %v3127_v56 = vpack.c.bf16 %v1879_v27, %v1878_v31  ;;  %v1790_v52 = vmax.f32 %v1720_v32, 0.0  ;;  %v2834_v35 = vpop.f32.mrb[22].mxu0  ;;  %3104 = vmatpush3.bf16.msra.mxu0 %v3103_v53 }
 0x488   : > { %v1881_v55 = vmul.f32 %v3961_v41, %v1791_v49  ;;  %v1735_v57 = vadd.f32 %v2834_v35, %v3893_v36  ;;  %v1729_v58 = vpop.f32.mrb[23].mxu0  ;;  %3105 = vmatprep.subr.bf16.mxu0 %v3422_v13 }
 0x489   : > { %v3106_v12 = vpack.c.bf16 %v1791_v49, %v1790_v52  ;;  %v1880_v63 = vmul.f32 %v3968_v44, %v1790_v52  ;;  %v1730_v17 = vadd.f32 %v3893_v36, %v1729_v58  ;;  %3128 = vmatpush3.bf16.msra.mxu1 %v3127_v56 }
 0x48a   : > { %v1793_v5 = vmax.f32 %v1735_v57, 0.0  ;;  %3129 = vmatprep.subr.bf16.mxu1 %v3422_v13 }
 0x48b   : > { %v3130_v59 = vpack.c.bf16 %v1881_v55, %v1880_v63  ;;  %v1792_v47 = vmax.f32 %v1730_v17, 0.0  ;;  %v2837_v26 = vpop.f32.mrb[24].mxu0  ;;  %3107 = vmatpush3.bf16.msra.mxu0 %v3106_v12  ;;  %v1965_v63 = vld [vmem:[%s4261_s7] sm:$0xff]  ;;  %v1966_v17 = vld [vmem:[%s4261_s7 + $0x8] sm:$0xff] }
 0x48c   : > { %v1883_v41 = vmul.f32 %v3975_v28, %v1793_v5  ;;  %v1745_v1 = vadd.f32 %v2837_v26, %v3893_v36  ;;  %v1739_v15 = vpop.f32.mrb[25].mxu0  ;;  %3108 = vmatprep.subr.bf16.mxu0 %v3422_v13 }
 0x48d   : > { %v3109_v62 = vpack.c.bf16 %v1793_v5, %v1792_v47  ;;  %v1882_v44 = vmul.f32 %v3981_v2, %v1792_v47  ;;  %v1740_v3 = vadd.f32 %v3893_v36, %v1739_v15  ;;  %3131 = vmatpush3.bf16.msra.mxu1 %v3130_v59 }
 0x48e   : > { %v1795_v6 = vmax.f32 %v1745_v1, 0.0  ;;  %3132 = vmatprep.subr.bf16.mxu1 %v3422_v13  ;;  %v1968_v1 = vld [vmem:[%s4261_s7 + $0x18] sm:$0xff] }
 0x48f   : > { %v3133_v33 = vpack.c.bf16 %v1883_v41, %v1882_v44  ;;  %v1794_v29 = vmax.f32 %v1740_v3, 0.0  ;;  %v2840_v4 = vpop.f32.mrb[26].mxu0  ;;  %3110 = vmatpush3.bf16.msra.mxu0 %v3109_v62  ;;  %v1967_v41 = vld [vmem:[%s4261_s7 + $0x10] sm:$0xff]  ;;  %v1970_v3 = vld [vmem:[%s4261_s7 + $0x28] sm:$0xff] }
 0x490   : > { %v1885_v28 = vmul.f32 %v3992_v54, %v1795_v6  ;;  %v1755_v7 = vadd.f32 %v2840_v4, %v3893_v36  ;;  %v1749_v48 = vpop.f32.mrb[27].mxu0  ;;  %3111 = vmatprep.subr.bf16.mxu0 %v3422_v13  ;;  %v1132_v54 = vmax.f32 %v1131_v9, 1.0 }
 0x491   : > { %v3112_v46 = vpack.c.bf16 %v1795_v6, %v1794_v29  ;;  %v1884_v2 = vmul.f32 %v3996_v40, %v1794_v29  ;;  %v1750_v10 = vadd.f32 %v3893_v36, %v1749_v48  ;;  %3134 = vmatpush3.bf16.msra.mxu1 %v3133_v33  ;;  %v1972_v6 = vld [vmem:[%s4261_s7 + $0x38] sm:$0xff]  ;;  %v2067_v29 = vld [vmem:[%s4263_s9 + $0x10] sm:$0xff]  ;;  %v1875_v48 = vpop.xlane.xlu1 %1874 }
 0x492   : > { %v1797_v18 = vmax.f32 %v1755_v7, 0.0  ;;  %3135 = vmatprep.subr.bf16.mxu1 %v3422_v13  ;;  %3354 = vrsqrt.f32 %v1132_v54  ;;  %v1876_v9 = vmax.f32 %v1875_v48, 1.0  ;;  %v2070_v54 = vld [vmem:[%s4263_s9 + $0x28] sm:$0xff] }
 0x493   : > { %v3136_v11 = vpack.c.bf16 %v1885_v28, %v1884_v2  ;;  %v1796_v39 = vmax.f32 %v1750_v10, 0.0  ;;  %v2843_v42 = vpop.f32.mrb[28].mxu0  ;;  %3113 = vmatpush3.bf16.msra.mxu0 %v3112_v46  ;;  %v2068_v28 = vld [vmem:[%s4263_s9 + $0x18] sm:$0xff] }
 0x494   : > { %v1887_v38 = vmul.f32 %v4003_v45, %v1797_v18  ;;  %v1765_v16 = vadd.f32 %v2843_v42, %v3893_v36  ;;  %v1759_v22 = vpop.f32.mrb[29].mxu0  ;;  %3114 = vmatprep.subr.bf16.mxu0 %v3422_v13  ;;  %v3170_v7 = vpack.c.bf16 %v2068_v28, %v2067_v29  ;;  %3356 = vrsqrt.f32 %v1876_v9  ;;  %v2069_v42 = vld [vmem:[%s4263_s9 + $0x20] sm:$0xff] }
 0x495   : > { %v3115_v23 = vpack.c.bf16 %v1797_v18, %v1796_v39  ;;  %v1886_v40 = vmul.f32 %v4007_v60, %v1796_v39  ;;  %v1760_v24 = vadd.f32 %v3893_v36, %v1759_v22  ;;  %3137 = vmatpush3.bf16.msra.mxu1 %v3136_v11  ;;  %v2072_v22 = vld [vmem:[%s4263_s9 + $0x38] sm:$0xff] }
 0x496   : > { %v1799_v51 = vmax.f32 %v1765_v16, 0.0  ;;  %3138 = vmatprep.subr.bf16.mxu1 %v3422_v13  ;;  %v2071_v16 = vld [vmem:[%s4263_s9 + $0x30] sm:$0xff] }
 0x497   : > { %v3139_v25 = vpack.c.bf16 %v1887_v38, %v1886_v40  ;;  %v1798_v27 = vmax.f32 %v1760_v24, 0.0  ;;  %v2846_v14 = vpop.f32.mrb[30].mxu0  ;;  %3116 = vmatpush3.bf16.msra.mxu0 %v3115_v23  ;;  %v3174_v38 = vpack.c.bf16 %v2070_v54, %v2069_v42  ;;  %v3178_v23 = vpack.c.bf16 %v2072_v22, %v2071_v16  ;;  %v2373_v40 = vld [vmem:[%s4262_s8] ss:$0 sm:$0xff] }
 0x498   : > { %v1889_v45 = vmul.f32 %v4011_v61, %v1799_v51  ;;  %v1775_v30 = vadd.f32 %v2846_v14, %v3893_v36  ;;  %v1769_v53 = vpop.f32.mrb[31].mxu0  ;;  %3117 = vmatprep.subr.bf16.mxu0 %v3422_v13 }
 0x499   : > { %v3118_v31 = vpack.c.bf16 %v1799_v51, %v1798_v27  ;;  %v1888_v60 = vmul.f32 %v4015_v0, %v1798_v27  ;;  %v1770_v32 = vadd.f32 %v3893_v36, %v1769_v53  ;;  %3140 = vmatpush3.bf16.msra.mxu1 %v3139_v25 }
 0x49a   : > { %v1801_v49 = vmax.f32 %v1775_v30, 0.0  ;;  %3141 = vmatprep.subr.bf16.mxu1 %v3422_v13 }
 0x49b   : > { %v3142_v56 = vpack.c.bf16 %v1889_v45, %v1888_v60  ;;  %v1800_v52 = vmax.f32 %v1770_v32, 0.0  ;;  %v2849_v35 = vpop.f32.mrb[32].mxu0  ;;  %3119 = vmatpush3.bf16.msra.mxu0 %v3118_v31  ;;  %v2376_v31 = vld [vmem:[%s4264_s10] ss:$0 sm:$0xff] }
 0x49c   : > { %v1891_v61 = vmul.f32 %v4019_v34, %v1801_v49  ;;  %v1785_v55 = vadd.f32 %v2849_v35, %v3893_v36  ;;  %v1779_v57 = vpop.f32.mrb[33].mxu0  ;;  %3120 = vmatprep.subr.bf16.mxu0 %v3422_v13  ;;  %v3355_v15 = vpop.eup %3354 }
 0x49d   : > { %v3121_v58 = vpack.c.bf16 %v1801_v49, %v1800_v52  ;;  %v1890_v0 = vmul.f32 %v4023_v8, %v1800_v52  ;;  %v1780_v12 = vadd.f32 %v3893_v36, %v1779_v57  ;;  %3143 = vmatpush3.bf16.msra.mxu1 %v3142_v56  ;;  %v3150_v36 = vpack.c.bf16 %v1966_v17, %v1965_v63 }
 0x49e   : > { %v1803_v34 = vmax.f32 %v1785_v55, 0.0  ;;  %3144 = vmatprep.subr.bf16.mxu1 %v3422_v13  ;;  %v1220_v44 = vmul.f32 %v3355_v15, %v4090_v21  ;;  %v1971_v21 = vld [vmem:[%s4261_s7 + $0x30] sm:$0xff]  ;;  %v3357_v46 = vpop.eup %3356 }
 0x49f   : > { %v3145_v5 = vpack.c.bf16 %v1891_v61, %v1890_v0  ;;  %v1802_v59 = vmax.f32 %v1780_v12, 0.0  ;;  %3122 = vmatpush3.bf16.msra.mxu0 %v3121_v58  ;;  %v3162_v33 = vpack.c.bf16 %v1972_v6, %v1971_v21 }
 0x4a0   : > { %v1893_v47 = vmul.f32 %v4027_v50, %v1803_v34  ;;  %3123 = vmatprep.subr.bf16.mxu0 %v3422_v13  ;;  %v3154_v50 = vpack.c.bf16 %v1968_v1, %v1967_v41 }
 0x4a1   : > { %v3124_v8 = vpack.c.bf16 %v1803_v34, %v1802_v59  ;;  %v1892_v26 = vmul.f32 %v4031_v37, %v1802_v59  ;;  %3146 = vmatpush3.bf16.msra.mxu1 %v3145_v5  ;;  %v1969_v37 = vld [vmem:[%s4261_s7 + $0x20] sm:$0xff] }
 0x4a2   : > { %3147 = vmatprep.subr.bf16.mxu1 %v3422_v13  ;;  %v3158_v13 = vpack.c.bf16 %v1970_v3, %v1969_v37 }
 0x4a3   : > { %v3148_v62 = vpack.c.bf16 %v1893_v47, %v1892_v26  ;;  %3125 = vmatpush3.bf16.msra.mxu0 %v3124_v8 }
 0x4a4   : > { %3151 = vmatprep.subr.bf16.mxu0 %v3150_v36 }
 0x4a5   : > { %3149 = vmatpush3.bf16.msra.mxu1 %v3148_v62 }
 0x4a6   : > { %2883 = vmatmul.mubr.f32.vlgmr.msra.gmra.mrb[34].mxu0 %v3990_v20  ;;  %v2065_v20 = vld [vmem:[%s4263_s9] sm:$0xff] }
 0x4a7   : > { %2936 = vmatprep.mubr.msk.f32.mxu0 %vm850_vm1, %v1220_v44  ;;  %3153 = vmatpush3.bf16.msra.mxu0 %v3150_v36 }
 0x4a8   : > { %2918 = vmatmul.mubr.f32.vlgmr.msra.gmra.mrb[34].mxu1 %v4093_v43  ;;  %3155 = vmatprep.subr.bf16.mxu0 %v3154_v50  ;;  %v2066_v43 = vld [vmem:[%s4263_s9 + $0x8] sm:$0xff] }
 0x4a9   : > { %v3166_v4 = vpack.c.bf16 %v2066_v43, %v2065_v20 }
 0x4ab   : > { %3157 = vmatpush3.bf16.msra.mxu0 %v3154_v50  ;;  %3167 = vmatprep.subr.bf16.mxu1 %v3166_v4 }
 0x4ac   : > { %3159 = vmatprep.subr.bf16.mxu0 %v3158_v13  ;;  %3169 = vmatpush3.bf16.msra.mxu1 %v3166_v4 }
 0x4ad   : > { %3171 = vmatprep.subr.bf16.mxu1 %v3170_v7 }
 0x4af   : > { %3161 = vmatpush3.bf16.msra.mxu0 %v3158_v13 }
 0x4b0   : > { %3163 = vmatprep.subr.bf16.mxu0 %v3162_v33  ;;  %3173 = vmatpush3.bf16.msra.mxu1 %v3170_v7 }
 0x4b1   : > { %3175 = vmatprep.subr.bf16.mxu1 %v3174_v38 }
 0x4b3   : > { %3165 = vmatpush3.bf16.msra.mxu0 %v3162_v33 }
 0x4b4   : > { %3177 = vmatpush3.bf16.msra.mxu1 %v3174_v38 }
 0x4b5   : > { %3179 = vmatprep.subr.bf16.mxu1 %v3178_v23 }
 0x4b8   : > { %3181 = vmatpush3.bf16.msra.mxu1 %v3178_v23 }
 0x579   : > { %v1870_v2 = vpop.f32.mrb[34].mxu0 }
 0x57a   : > { %v2884_v10 = vpop.f32.mrb[35].mxu0 }
 0x57b   : > { %v1960_v18 = vpop.f32.mrb[34].mxu1 }
 0x57c   : > { %v1964_v11 = vmul.f32 %v3357_v46, %v1960_v18  ;;  %v2919_v39 = vpop.f32.mrb[35].mxu1 }
 0x57e   : > { %2937 = vmatmul.mubr.msk.f32.vlgmr.msra.gmra.mrb[36].mxu0 %vm850_vm1, %v1964_v11 }
 0x651   : > { %v2938_v24 = vpop.f32.mrb[36].mxu0 }
 0x652   : > { %v2058_v51 = vadd.f32 %v2938_v24, %v2373_v40  ;;  %v2052_v25 = vpop.f32.mrb[37].mxu0 }
 0x653   : > { %v2053_v27 = vadd.f32 %v2373_v40, %v2052_v25 }
 0x654   : > { %v2062_v14 = vmax.f32 %v2058_v51, 0.0 }
 0x655   : > { %v2061_v45 = vmax.f32 %v2053_v27, 0.0 }
 0x656   : > { %v2064_v30 = vadd.f32 %v2062_v14, %v1870_v2 }
 0x657   : > { %v2063_v53 = vadd.f32 %v2061_v45, %v4070_v19 }
 0x659   : > { %2955 = vmatprep.mubr.msk.f32.mxu1 %vm850_vm1, %v2063_v53 }
 0x65a   : > { %2956 = vmatmul.mubr.msk.f32.vlgmr.msra.gmra.mrb[36].mxu1 %vm850_vm1, %v2064_v30 }
 0x72d   : > { %v2957_v60 = vpop.f32.mrb[36].mxu1 }
 0x72e   : > { %v2158_v32 = vadd.f32 %v2957_v60, %v2376_v31  ;;  %v2152_v19 = vpop.f32.mrb[37].mxu1 }
 0x72f   : > { %v2153_v49 = vadd.f32 %v2376_v31, %v2152_v19 }
 0x730   : > { %2162 = vst [vmem:[%s434_s24 + $0x8] sm:$0xff] %v2158_v32 }
 0x731   : > { %2161 = vst [vmem:[%s434_s24] sm:$0xff] %v2153_v49 }
 0x732   : > { %3371 = shalt.err (!%p3368_p3)
}
 0x733   : > { %s3372_s14 = scalar_lea.hbm %s4211_s19, 256  ;;  %s3376_s16 = scalar_lea.hbm %s4265_s11, 512 }
 0x734   : > { %p3373_p4 = scmp.ne.s32.totalorder %s4211_s19, %s3372_s14  ;;  %p3377_p9 = scmp.lt.u32.totalorder %s4211_s19, %s4265_s11 }
 0x735   : > { %p3378_p10 = scmp.lt.u32.totalorder %s3376_s16, %s3372_s14  ;;  %p3380_p12 = scmp.lt.u32.totalorder %s3372_s14, %s4211_s19 }
 0x736   : > { %p3374_p7 = pnand %p3373_p4, %p3526_p5 }
 0x737   : > { %p3379_p11 = por %p3378_p10, %p3377_p9 }
 0x738   : > { %p3375_p8 = pneg %p3374_p7 }
 0x739   : > { %p3381_p13 = por %p3380_p12, %p3379_p11 }
 0x73b   : > { %p3382_p0 = pnand %p3381_p13, %p3375_p8 }
 0x73d   : > { %3385 = shalt.err (!%p3382_p0)
}
 0x73e   : > { %s3426_s1 = smov 128   ;;  %s3427_s29 = smov 8  }
 0x73f   : > { %3182 = dma.vmem_to_hbm [thread:$0]  (%p3526_p5), %s4206_s25, 256, %s4211_s19, %s4213_s26, %s3426_s1, %s3426_s1, %s3427_s29  }
 0x740 PF: > { %p3188_p1 = scmp.ge.s32.totalorder %s3420_s20, 2  ;;  %s2192_s30 = sand.u32 1, %s3408_s17  }
 0x741   : > { %s2193_s21 = scalar_lea.sflag [#allocation3], %s2192_s30 }
 0x742   : > { %p3185_p2 = pnand %p3188_p1, %p3530_p6 }
 0x744   : > { %3403 = dma.done.wait (!%p3185_p2), %s2193_s21, 256  }
 0x745   : > { %3405 = vsyncadd (!%p3185_p2), %s2193_s21, 4294967040  ;;  %s4275_s12 = sld [smem:[#allocation5_spill]]  ;;  %s4276_s19 = sld [smem:[#allocation6_spill]] }
 0x746   : > { %p21_p3 = scmp.ge.s32.totalorder %s3513_s23, 4   ;;  %s4277_s17 = smov %s3412_s18 }
 0x747   : > { %s4279_s20 = smov %s3513_s23 }
 0x748   :  { %23 = sbr.rel (!%p21_p3) target bundleno = 6 (0x6), region = 112 }
 0x74b   : > { %s4278_s18 = smov %s4275_s12 }
 0x74f   :  { %2198 = vsyncpa [#allocation3], 1 }
 0x750   :  { %2200 = vsyncpa [#allocation3 + $0x1], 1 }

</bundles_post_ra>
